<compile_context>
chip_gen: v7x
topology: tpu7x:2x2x1
jax: 0.10.0
libtpu: 0.0.40
codegen_flags: <defaults>
</compile_context>

<pallas_src>
import jax
import jax.numpy as jnp
from jax.experimental import pallas as pl
from jax.experimental.pallas import tpu as pltpu


def _permute_lane_dense_kernel(x_ref, o_ref):
    # x_ref block: (1, H, TS, D)   o_ref block: (1, TS, H*D)  (lane-dense)
    H = x_ref.shape[1]
    D = x_ref.shape[3]
    # Group heads so each VMEM store spans a whole number of 128-lane vregs
    # (unmasked vst).  For D=64 -> g=2 (head pairs), 6 stores instead of 12.
    if D < 128 and 128 % D == 0 and H % (128 // D) == 0:
        g = 128 // D
    else:
        g = 1
    for h0 in range(0, H, g):            # static, fully unrolled (H is small)
        if g == 1:
            blk = x_ref[0, h0, :, :]
        else:
            blk = jnp.concatenate(
                [x_ref[0, h0 + j, :, :] for j in range(g)], axis=-1)
        o_ref[0, :, h0 * D:(h0 + g) * D] = blk


def _permute_transpose_kernel(x_ref, o_ref):
    # Fallback for shapes where the lane-dense layout does not apply:
    # on-chip transpose, output kept as (1, TS, H, D).
    o_ref[...] = jnp.transpose(x_ref[...], (0, 2, 1, 3))


def _pick_tile_s(S, max_tile=256):
    """Tile along S: multiple of 8, divides S, >= 2 grid steps, preferring an
    even number of steps (even megacore split on v7x) and as few steps as
    possible (per-grid-step overhead dominates for this tiny transfer)."""
    divisors = [t for t in range(8, S + 1, 8) if S % t == 0 and S // t >= 2]
    if not divisors:
        return S  # tiny / indivisible S: single step, full-extent block
    even = [t for t in divisors if (S // t) % 2 == 0 and t <= max_tile]
    if even:
        return max(even)
    capped = [t for t in divisors if t <= max_tile]
    return max(capped) if capped else max(divisors)


def _permute_call(kernel, x, tile_s, out_shape, out_block, out_index_map):
    B, H, S, D = x.shape
    return pl.pallas_call(
        kernel,
        out_shape=out_shape,
        grid_spec=pltpu.PrefetchScalarGridSpec(
            num_scalar_prefetch=0,
            grid=(B, S // tile_s),
            in_specs=[pl.BlockSpec((1, H, tile_s, D), lambda b, s: (b, 0, s, 0))],
            out_specs=pl.BlockSpec(out_block, out_index_map),
        ),
        compiler_params=pltpu.CompilerParams(
            dimension_semantics=("parallel", "parallel"),
        ),
    )(x)


def permute_0213(x, *, tile_s=None):
    """Pallas implementation of x.permute(0, 2, 1, 3) for a [B, H, S, D] tensor."""
    B, H, S, D = x.shape
    if tile_s is None or S % tile_s != 0 or (tile_s % 8 != 0 and tile_s != S):
        tile_s = _pick_tile_s(S)

    lane_dense_ok = (H * D) % 128 == 0 and (tile_s % 8 == 0 or tile_s == S)
    if lane_dense_ok:
        out = _permute_call(
            _permute_lane_dense_kernel, x, tile_s,
            out_shape=jax.ShapeDtypeStruct((B, S, H * D), x.dtype),
            out_block=(1, tile_s, H * D),
            out_index_map=lambda b, s: (b, s, 0),
        )
        return out.reshape(B, S, H, D)

    return _permute_call(
        _permute_transpose_kernel, x, tile_s,
        out_shape=jax.ShapeDtypeStruct((B, S, H, D), x.dtype),
        out_block=(1, tile_s, H, D),
        out_index_map=lambda b, s: (b, s, 0, 0),
    )


if __name__ == "__main__":
    key = jax.random.PRNGKey(0)
    # Same shape as the torch module's input: [1, 12, 384, 64]
    x = jax.random.normal(key, (1, 12, 384, 64), dtype=jnp.float32)

    out = jax.block_until_ready(permute_0213(x))

    ref = jnp.transpose(x, (0, 2, 1, 3))
    assert out.shape == (1, 384, 12, 64), out.shape
    assert out.dtype == x.dtype
    assert bool(jnp.array_equal(out, ref)), "mismatch vs reference permute"

    print("KERNEL_OK")
</pallas_src>

<mosaic_0001>
module attributes {stable_mosaic.version = 11 : i64} {
  func.func @_permute_lane_dense_kernel(%arg0: i32, %arg1: i32, %arg2: memref<1x12x192x64xf32, #tpu.memory_space<vmem>>, %arg3: memref<1x192x768xf32, #tpu.memory_space<vmem>>) attributes {dimension_semantics = [#tpu.dimension_semantics<parallel>, #tpu.dimension_semantics<parallel>], iteration_bounds = array<i64: 1, 2>, scalar_prefetch = 0 : i64, scratch_operands = 0 : i64, tpu.core_type = #tpu.core_type<tc>, window_params = [{transform_indices = @transform_0, window_bounds = array<i64: 1, 12, 192, 64>}, {transform_indices = @transform_1, window_bounds = array<i64: 1, 192, 768>}]} {
    %c0 = arith.constant 0 : index
    %c0_0 = arith.constant 0 : index
    %c0_1 = arith.constant 0 : index
    %c0_2 = arith.constant 0 : index
    %0 = vector.load %arg2[%c0, %c0_0, %c0_1, %c0_2] : memref<1x12x192x64xf32, #tpu.memory_space<vmem>>, vector<1x1x192x64xf32>
    %1 = vector.shape_cast %0 : vector<1x1x192x64xf32> to vector<192x64xf32>
    %c0_3 = arith.constant 0 : index
    %c1 = arith.constant 1 : index
    %c0_4 = arith.constant 0 : index
    %c0_5 = arith.constant 0 : index
    %2 = vector.load %arg2[%c0_3, %c1, %c0_4, %c0_5] : memref<1x12x192x64xf32, #tpu.memory_space<vmem>>, vector<1x1x192x64xf32>
    %3 = vector.shape_cast %2 : vector<1x1x192x64xf32> to vector<192x64xf32>
    %4 = tpu.concatenate %1, %3 in 1 : vector<192x64xf32>, vector<192x64xf32> -> vector<192x128xf32>
    %c0_6 = arith.constant 0 : index
    %c0_7 = arith.constant 0 : index
    %c0_8 = arith.constant 0 : index
    %5 = vector.load %arg3[%c0_6, %c0_7, %c0_8] : memref<1x192x768xf32, #tpu.memory_space<vmem>>, vector<1x192x128xf32>
    %6 = vector.shape_cast %5 : vector<1x192x128xf32> to vector<192x128xf32>
    %7 = vector.shape_cast %4 : vector<192x128xf32> to vector<1x192x128xf32>
    tpu.vector_store %arg3[%c0_6, %c0_7, %c0_8], %7 {strides = array<i32>} : memref<1x192x768xf32, #tpu.memory_space<vmem>>, vector<1x192x128xf32>,
    %c0_9 = arith.constant 0 : index
    %c2 = arith.constant 2 : index
    %c0_10 = arith.constant 0 : index
    %c0_11 = arith.constant 0 : index
    %8 = vector.load %arg2[%c0_9, %c2, %c0_10, %c0_11] : memref<1x12x192x64xf32, #tpu.memory_space<vmem>>, vector<1x1x192x64xf32>
    %9 = vector.shape_cast %8 : vector<1x1x192x64xf32> to vector<192x64xf32>
    %c0_12 = arith.constant 0 : index
    %c3 = arith.constant 3 : index
    %c0_13 = arith.constant 0 : index
    %c0_14 = arith.constant 0 : index
    %10 = vector.load %arg2[%c0_12, %c3, %c0_13, %c0_14] : memref<1x12x192x64xf32, #tpu.memory_space<vmem>>, vector<1x1x192x64xf32>
    %11 = vector.shape_cast %10 : vector<1x1x192x64xf32> to vector<192x64xf32>
    %12 = tpu.concatenate %9, %11 in 1 : vector<192x64xf32>, vector<192x64xf32> -> vector<192x128xf32>
    %c0_15 = arith.constant 0 : index
    %c0_16 = arith.constant 0 : index
    %c128 = arith.constant 128 : index
    %13 = vector.load %arg3[%c0_15, %c0_16, %c128] : memref<1x192x768xf32, #tpu.memory_space<vmem>>, vector<1x192x128xf32>
    %14 = vector.shape_cast %13 : vector<1x192x128xf32> to vector<192x128xf32>
    %15 = vector.shape_cast %12 : vector<192x128xf32> to vector<1x192x128xf32>
    tpu.vector_store %arg3[%c0_15, %c0_16, %c128], %15 {strides = array<i32>} : memref<1x192x768xf32, #tpu.memory_space<vmem>>, vector<1x192x128xf32>,
    %c0_17 = arith.constant 0 : index
    %c4 = arith.constant 4 : index
    %c0_18 = arith.constant 0 : index
    %c0_19 = arith.constant 0 : index
    %16 = vector.load %arg2[%c0_17, %c4, %c0_18, %c0_19] : memref<1x12x192x64xf32, #tpu.memory_space<vmem>>, vector<1x1x192x64xf32>
    %17 = vector.shape_cast %16 : vector<1x1x192x64xf32> to vector<192x64xf32>
    %c0_20 = arith.constant 0 : index
    %c5 = arith.constant 5 : index
    %c0_21 = arith.constant 0 : index
    %c0_22 = arith.constant 0 : index
    %18 = vector.load %arg2[%c0_20, %c5, %c0_21, %c0_22] : memref<1x12x192x64xf32, #tpu.memory_space<vmem>>, vector<1x1x192x64xf32>
    %19 = vector.shape_cast %18 : vector<1x1x192x64xf32> to vector<192x64xf32>
    %20 = tpu.concatenate %17, %19 in 1 : vector<192x64xf32>, vector<192x64xf32> -> vector<192x128xf32>
    %c0_23 = arith.constant 0 : index
    %c0_24 = arith.constant 0 : index
    %c256 = arith.constant 256 : index
    %21 = vector.load %arg3[%c0_23, %c0_24, %c256] : memref<1x192x768xf32, #tpu.memory_space<vmem>>, vector<1x192x128xf32>
    %22 = vector.shape_cast %21 : vector<1x192x128xf32> to vector<192x128xf32>
    %23 = vector.shape_cast %20 : vector<192x128xf32> to vector<1x192x128xf32>
    tpu.vector_store %arg3[%c0_23, %c0_24, %c256], %23 {strides = array<i32>} : memref<1x192x768xf32, #tpu.memory_space<vmem>>, vector<1x192x128xf32>,
    %c0_25 = arith.constant 0 : index
    %c6 = arith.constant 6 : index
    %c0_26 = arith.constant 0 : index
    %c0_27 = arith.constant 0 : index
    %24 = vector.load %arg2[%c0_25, %c6, %c0_26, %c0_27] : memref<1x12x192x64xf32, #tpu.memory_space<vmem>>, vector<1x1x192x64xf32>
    %25 = vector.shape_cast %24 : vector<1x1x192x64xf32> to vector<192x64xf32>
    %c0_28 = arith.constant 0 : index
    %c7 = arith.constant 7 : index
    %c0_29 = arith.constant 0 : index
    %c0_30 = arith.constant 0 : index
    %26 = vector.load %arg2[%c0_28, %c7, %c0_29, %c0_30] : memref<1x12x192x64xf32, #tpu.memory_space<vmem>>, vector<1x1x192x64xf32>
    %27 = vector.shape_cast %26 : vector<1x1x192x64xf32> to vector<192x64xf32>
    %28 = tpu.concatenate %25, %27 in 1 : vector<192x64xf32>, vector<192x64xf32> -> vector<192x128xf32>
    %c0_31 = arith.constant 0 : index
    %c0_32 = arith.constant 0 : index
    %c384 = arith.constant 384 : index
    %29 = vector.load %arg3[%c0_31, %c0_32, %c384] : memref<1x192x768xf32, #tpu.memory_space<vmem>>, vector<1x192x128xf32>
    %30 = vector.shape_cast %29 : vector<1x192x128xf32> to vector<192x128xf32>
    %31 = vector.shape_cast %28 : vector<192x128xf32> to vector<1x192x128xf32>
    tpu.vector_store %arg3[%c0_31, %c0_32, %c384], %31 {strides = array<i32>} : memref<1x192x768xf32, #tpu.memory_space<vmem>>, vector<1x192x128xf32>,
    %c0_33 = arith.constant 0 : index
    %c8 = arith.constant 8 : index
    %c0_34 = arith.constant 0 : index
    %c0_35 = arith.constant 0 : index
    %32 = vector.load %arg2[%c0_33, %c8, %c0_34, %c0_35] : memref<1x12x192x64xf32, #tpu.memory_space<vmem>>, vector<1x1x192x64xf32>
    %33 = vector.shape_cast %32 : vector<1x1x192x64xf32> to vector<192x64xf32>
    %c0_36 = arith.constant 0 : index
    %c9 = arith.constant 9 : index
    %c0_37 = arith.constant 0 : index
    %c0_38 = arith.constant 0 : index
    %34 = vector.load %arg2[%c0_36, %c9, %c0_37, %c0_38] : memref<1x12x192x64xf32, #tpu.memory_space<vmem>>, vector<1x1x192x64xf32>
    %35 = vector.shape_cast %34 : vector<1x1x192x64xf32> to vector<192x64xf32>
    %36 = tpu.concatenate %33, %35 in 1 : vector<192x64xf32>, vector<192x64xf32> -> vector<192x128xf32>
    %c0_39 = arith.constant 0 : index
    %c0_40 = arith.constant 0 : index
    %c512 = arith.constant 512 : index
    %37 = vector.load %arg3[%c0_39, %c0_40, %c512] : memref<1x192x768xf32, #tpu.memory_space<vmem>>, vector<1x192x128xf32>
    %38 = vector.shape_cast %37 : vector<1x192x128xf32> to vector<192x128xf32>
    %39 = vector.shape_cast %36 : vector<192x128xf32> to vector<1x192x128xf32>
    tpu.vector_store %arg3[%c0_39, %c0_40, %c512], %39 {strides = array<i32>} : memref<1x192x768xf32, #tpu.memory_space<vmem>>, vector<1x192x128xf32>,
    %c0_41 = arith.constant 0 : index
    %c10 = arith.constant 10 : index
    %c0_42 = arith.constant 0 : index
    %c0_43 = arith.constant 0 : index
    %40 = vector.load %arg2[%c0_41, %c10, %c0_42, %c0_43] : memref<1x12x192x64xf32, #tpu.memory_space<vmem>>, vector<1x1x192x64xf32>
    %41 = vector.shape_cast %40 : vector<1x1x192x64xf32> to vector<192x64xf32>
    %c0_44 = arith.constant 0 : index
    %c11 = arith.constant 11 : index
    %c0_45 = arith.constant 0 : index
    %c0_46 = arith.constant 0 : index
    %42 = vector.load %arg2[%c0_44, %c11, %c0_45, %c0_46] : memref<1x12x192x64xf32, #tpu.memory_space<vmem>>, vector<1x1x192x64xf32>
    %43 = vector.shape_cast %42 : vector<1x1x192x64xf32> to vector<192x64xf32>
    %44 = tpu.concatenate %41, %43 in 1 : vector<192x64xf32>, vector<192x64xf32> -> vector<192x128xf32>
    %c0_47 = arith.constant 0 : index
    %c0_48 = arith.constant 0 : index
    %c640 = arith.constant 640 : index
    %45 = vector.load %arg3[%c0_47, %c0_48, %c640] : memref<1x192x768xf32, #tpu.memory_space<vmem>>, vector<1x192x128xf32>
    %46 = vector.shape_cast %45 : vector<1x192x128xf32> to vector<192x128xf32>
    %47 = vector.shape_cast %44 : vector<192x128xf32> to vector<1x192x128xf32>
    tpu.vector_store %arg3[%c0_47, %c0_48, %c640], %47 {strides = array<i32>} : memref<1x192x768xf32, #tpu.memory_space<vmem>>, vector<1x192x128xf32>,
    return
  }
  func.func @transform_0(%arg0: i32, %arg1: i32) -> (i32, i32, i32, i32) {
    %c0_i32 = arith.constant 0 : i32
    %c0_i32_0 = arith.constant 0 : i32
    %c0_i32_1 = arith.constant 0 : i32
    return %arg0, %c0_i32, %arg1, %c0_i32_0 : i32, i32, i32, i32
  }
  func.func @transform_1(%arg0: i32, %arg1: i32) -> (i32, i32, i32) {
    %c0_i32 = arith.constant 0 : i32
    %c0_i32_0 = arith.constant 0 : i32
    return %arg0, %arg1, %c0_i32 : i32, i32, i32
  }
}

</mosaic_0001>

<bundles_post_ra>
// kernel: tpu_custom_call.1
= control target key start
LH: loop header
LB: loop body
LE: loop exit
PB: predicated region body
PF: predicated region fallthrough
CT: control target
= control target key end

     0   :  { %6 = vsyncpa [#allocation4], 0  ;;  %s4441_s0 = inlined_call_operand.vmem [shape: f32[1,12,384,64], index: 0, kind: input, shape index: {}]   ;;  %s4442_s1 = inlined_call_operand.hbm [shape: f32[1,384,768], index: 1, kind: output, shape index: {}]  }
   0x1   :  { %8 = vsyncpa [#allocation4 + $0x1], 0  ;;  %s3012_s6 = smov 0   ;;  %s3014_s7 = smov 0  }
   0x2   :  { %s3016_s8 = smov 0   ;;  %s3018_s9 = smov 0  }
   0x3   :  { %s3020_s10 = smov 0   ;;  %s3022_s11 = smov 0  }
   0x4 LB: > { %s2581_s12 = sadd.s32 4294967295, %s2996_s11   ;;  %s2582_s13 = sadd.s32 4294967294, %s2996_s11   ;;  %s2996_s11 = sphi %s3022_s11, %s14_s11   ;;  %s2992_s10 = sphi %s3020_s10, %s4449_s10   ;;  %s2988_s9 = sphi %s3018_s9, %s4448_s9   ;;  %s2984_s8 = sphi %s3016_s8, %s4447_s8   ;;  %s2980_s7 = sphi %s3014_s7, %s4446_s7   ;;  %s2976_s6 = sphi %s3012_s6, %s4445_s6  }
   0x5   : > { %s23_s14 = sadd.s32 1, %s2992_s10  ;;  %s35_s15 = sadd.s32 1, %s2984_s8 }
   0x6   : > { %p24_p0 = scmp.ge.s32.totalorder %s23_s14, 2  ;;  %p42_p1 = scmp.ne.s32.totalorder %s2984_s8, %s2980_s7 }
   0x7   : > { %p43_p2 = scmp.eq.s32.totalorder %s2996_s11, 0  ;;  %p74_p3 = scmp.eq.s32.totalorder %s2581_s12, 1 }
   0x8   : > { %s4451_s14 = smov (%p24_p0, %s23_s14), 0  ;;  %p79_p6 = scmp.ne.s32.totalorder %s2980_s7, %s2976_s6 }
   0x9   : > { %p44_p4 = por %p43_p2, %p42_p1  ;;  %p3051_p5 = por %p74_p3, %p42_p1 }
   0xa   : > { %s31_s17 = ssub.s32 %s2992_s10, %s4451_s14  ;;  %p80_p8 = scmp.eq.s32.totalorder %s2582_s13, 1 }
   0xb   : > { %p33_p7 = scmp.eq.s32.totalorder %s31_s17, 0  ;;  %p2584_p10 = scmp.ge.s32.totalorder %s2996_s11, 2 }
   0xc   : > { %p3062_p9 = por %p80_p8, %p79_p6 }
   0xd   : > { %s3060_s18 = scalar_select %p33_p7, %s2984_s8, %s35_s15  }
   0xe   : > { %96 = sbr.rel (%p2584_p10) target bundleno = 170 (0xaa), region = 16 }
  0x15   : > { %99 = sbr.rel (!%p44_p4) target bundleno = 170 (0xaa), region = 20  ;;  %s101_s20 = sand.u32 (%p44_p4), 1, %s2984_s8  }
  0x16   : > { %s2854_s21 = smul.u32 (%p44_p4), 192, %s2992_s10 }
  0x17   : > { %s2855_s22 = smul.u32 (%p44_p4), 2304, %s101_s20 }
  0x18   : > { %s3074_s25 = scalar_lea.vmem (%p44_p4), %s4441_s0, %s2854_s21 }
  0x19   : > { %v710_v0 = vld [vmem:[%s3074_s25] sm:$0xff] (%p44_p4)  ;;  %v712_v1 = vld [vmem:[%s3074_s25 + $0x8] sm:$0xff] (%p44_p4)  ;;  %v714_v2 = vld [vmem:[%s3074_s25 + $0x10] sm:$0xff] (%p44_p4)  ;;  %s3079_s26 = scalar_lea.vmem (%p44_p4), [#allocation2], %s2855_s22 }
  0x1a   : > { %711 = vst [vmem:[%s3079_s26] sm:$0xff] (%p44_p4), %v710_v0  ;;  %713 = vst [vmem:[%s3079_s26 + $0x8] sm:$0xff] (%p44_p4), %v712_v1  ;;  %v716_v3 = vld [vmem:[%s3074_s25 + $0x18] sm:$0xff] (%p44_p4)  ;;  %v718_v4 = vld [vmem:[%s3074_s25 + $0x20] sm:$0xff] (%p44_p4) }
  0x1b   : > { %715 = vst [vmem:[%s3079_s26 + $0x10] sm:$0xff] (%p44_p4), %v714_v2  ;;  %v720_v5 = vld [vmem:[%s3074_s25 + $0x28] sm:$0xff] (%p44_p4)  ;;  %717 = vst [vmem:[%s3079_s26 + $0x18] sm:$0xff] (%p44_p4), %v716_v3  ;;  %v722_v6 = vld [vmem:[%s3074_s25 + $0x30] sm:$0xff] (%p44_p4) }
  0x1c   : > { %719 = vst [vmem:[%s3079_s26 + $0x20] sm:$0xff] %v718_v4  ;;  %721 = vst [vmem:[%s3079_s26 + $0x28] sm:$0xff] %v720_v5  ;;  %v724_v7 = vld [vmem:[%s3074_s25 + $0x38] sm:$0xff]  ;;  %v726_v8 = vld [vmem:[%s3074_s25 + $0x40] sm:$0xff] }
  0x1d   : > { %723 = vst [vmem:[%s3079_s26 + $0x30] sm:$0xff] %v722_v6  ;;  %725 = vst [vmem:[%s3079_s26 + $0x38] sm:$0xff] %v724_v7  ;;  %v728_v9 = vld [vmem:[%s3074_s25 + $0x48] sm:$0xff]  ;;  %v730_v10 = vld [vmem:[%s3074_s25 + $0x50] sm:$0xff] }
  0x1e   : > { %727 = vst [vmem:[%s3079_s26 + $0x40] sm:$0xff] %v726_v8  ;;  %v732_v11 = vld [vmem:[%s3074_s25 + $0x58] sm:$0xff]  ;;  %729 = vst [vmem:[%s3079_s26 + $0x48] sm:$0xff] %v728_v9  ;;  %v734_v12 = vld [vmem:[%s3074_s25 + $0x60] sm:$0xff] }
  0x1f   : > { %731 = vst [vmem:[%s3079_s26 + $0x50] sm:$0xff] %v730_v10  ;;  %733 = vst [vmem:[%s3079_s26 + $0x58] sm:$0xff] %v732_v11  ;;  %v736_v13 = vld [vmem:[%s3074_s25 + $0x68] sm:$0xff]  ;;  %v738_v14 = vld [vmem:[%s3074_s25 + $0x70] sm:$0xff] }
  0x20   : > { %735 = vst [vmem:[%s3079_s26 + $0x60] sm:$0xff] %v734_v12  ;;  %737 = vst [vmem:[%s3079_s26 + $0x68] sm:$0xff] %v736_v13  ;;  %v740_v15 = vld [vmem:[%s3074_s25 + $0x78] sm:$0xff]  ;;  %v742_v16 = vld [vmem:[%s3074_s25 + $0x80] sm:$0xff] }
  0x21   : > { %739 = vst [vmem:[%s3079_s26 + $0x70] sm:$0xff] %v738_v14  ;;  %v744_v17 = vld [vmem:[%s3074_s25 + $0x88] sm:$0xff]  ;;  %741 = vst [vmem:[%s3079_s26 + $0x78] sm:$0xff] %v740_v15  ;;  %v746_v18 = vld [vmem:[%s3074_s25 + $0x90] sm:$0xff] }
  0x22   : > { %743 = vst [vmem:[%s3079_s26 + $0x80] sm:$0xff] %v742_v16  ;;  %745 = vst [vmem:[%s3079_s26 + $0x88] sm:$0xff] %v744_v17  ;;  %v748_v19 = vld [vmem:[%s3074_s25 + $0x98] sm:$0xff]  ;;  %v750_v20 = vld [vmem:[%s3074_s25 + $0xa0] sm:$0xff] }
  0x23   : > { %747 = vst [vmem:[%s3079_s26 + $0x90] sm:$0xff] %v746_v18  ;;  %749 = vst [vmem:[%s3079_s26 + $0x98] sm:$0xff] %v748_v19  ;;  %v752_v21 = vld [vmem:[%s3074_s25 + $0xa8] sm:$0xff]  ;;  %v754_v22 = vld [vmem:[%s3074_s25 + $0xb0] sm:$0xff] }
  0x24   : > { %751 = vst [vmem:[%s3079_s26 + $0xa0] sm:$0xff] %v750_v20  ;;  %v756_v23 = vld [vmem:[%s3074_s25 + $0xb8] sm:$0xff]  ;;  %753 = vst [vmem:[%s3079_s26 + $0xa8] sm:$0xff] %v752_v21  ;;  %v758_v24 = vld [vmem:[%s3074_s25 + $0x180] sm:$0xff] }
  0x25   : > { %755 = vst [vmem:[%s3079_s26 + $0xb0] sm:$0xff] %v754_v22  ;;  %757 = vst [vmem:[%s3079_s26 + $0xb8] sm:$0xff] %v756_v23  ;;  %v760_v25 = vld [vmem:[%s3074_s25 + $0x188] sm:$0xff]  ;;  %v762_v26 = vld [vmem:[%s3074_s25 + $0x190] sm:$0xff] }
  0x26   : > { %759 = vst [vmem:[%s3079_s26 + $0xc0] sm:$0xff] %v758_v24  ;;  %761 = vst [vmem:[%s3079_s26 + $0xc8] sm:$0xff] %v760_v25  ;;  %v764_v27 = vld [vmem:[%s3074_s25 + $0x198] sm:$0xff]  ;;  %v766_v28 = vld [vmem:[%s3074_s25 + $0x1a0] sm:$0xff] }
  0x27   : > { %763 = vst [vmem:[%s3079_s26 + $0xd0] sm:$0xff] %v762_v26  ;;  %v768_v29 = vld [vmem:[%s3074_s25 + $0x1a8] sm:$0xff]  ;;  %765 = vst [vmem:[%s3079_s26 + $0xd8] sm:$0xff] %v764_v27  ;;  %v770_v30 = vld [vmem:[%s3074_s25 + $0x1b0] sm:$0xff] }
  0x28   : > { %767 = vst [vmem:[%s3079_s26 + $0xe0] sm:$0xff] %v766_v28  ;;  %769 = vst [vmem:[%s3079_s26 + $0xe8] sm:$0xff] %v768_v29  ;;  %v772_v31 = vld [vmem:[%s3074_s25 + $0x1b8] sm:$0xff]  ;;  %v774_v32 = vld [vmem:[%s3074_s25 + $0x1c0] sm:$0xff] }
  0x29   : > { %771 = vst [vmem:[%s3079_s26 + $0xf0] sm:$0xff] %v770_v30  ;;  %773 = vst [vmem:[%s3079_s26 + $0xf8] sm:$0xff] %v772_v31  ;;  %v776_v33 = vld [vmem:[%s3074_s25 + $0x1c8] sm:$0xff]  ;;  %v778_v34 = vld [vmem:[%s3074_s25 + $0x1d0] sm:$0xff] }
  0x2a   : > { %775 = vst [vmem:[%s3079_s26 + $0x100] sm:$0xff] %v774_v32  ;;  %v780_v35 = vld [vmem:[%s3074_s25 + $0x1d8] sm:$0xff]  ;;  %777 = vst [vmem:[%s3079_s26 + $0x108] sm:$0xff] %v776_v33  ;;  %v782_v36 = vld [vmem:[%s3074_s25 + $0x1e0] sm:$0xff] }
  0x2b   : > { %779 = vst [vmem:[%s3079_s26 + $0x110] sm:$0xff] %v778_v34  ;;  %781 = vst [vmem:[%s3079_s26 + $0x118] sm:$0xff] %v780_v35  ;;  %v784_v37 = vld [vmem:[%s3074_s25 + $0x1e8] sm:$0xff]  ;;  %v786_v38 = vld [vmem:[%s3074_s25 + $0x1f0] sm:$0xff] }
  0x2c   : > { %783 = vst [vmem:[%s3079_s26 + $0x120] sm:$0xff] %v782_v36  ;;  %785 = vst [vmem:[%s3079_s26 + $0x128] sm:$0xff] %v784_v37  ;;  %v788_v39 = vld [vmem:[%s3074_s25 + $0x1f8] sm:$0xff]  ;;  %v790_v40 = vld [vmem:[%s3074_s25 + $0x200] sm:$0xff] }
  0x2d   : > { %787 = vst [vmem:[%s3079_s26 + $0x130] sm:$0xff] %v786_v38  ;;  %v792_v41 = vld [vmem:[%s3074_s25 + $0x208] sm:$0xff]  ;;  %789 = vst [vmem:[%s3079_s26 + $0x138] sm:$0xff] %v788_v39  ;;  %v794_v42 = vld [vmem:[%s3074_s25 + $0x210] sm:$0xff] }
  0x2e   : > { %791 = vst [vmem:[%s3079_s26 + $0x140] sm:$0xff] %v790_v40  ;;  %793 = vst [vmem:[%s3079_s26 + $0x148] sm:$0xff] %v792_v41  ;;  %v796_v43 = vld [vmem:[%s3074_s25 + $0x218] sm:$0xff]  ;;  %v798_v44 = vld [vmem:[%s3074_s25 + $0x220] sm:$0xff] }
  0x2f   : > { %795 = vst [vmem:[%s3079_s26 + $0x150] sm:$0xff] %v794_v42  ;;  %797 = vst [vmem:[%s3079_s26 + $0x158] sm:$0xff] %v796_v43  ;;  %v800_v45 = vld [vmem:[%s3074_s25 + $0x228] sm:$0xff]  ;;  %v802_v46 = vld [vmem:[%s3074_s25 + $0x230] sm:$0xff] }
  0x30   : > { %799 = vst [vmem:[%s3079_s26 + $0x160] sm:$0xff] %v798_v44  ;;  %v804_v47 = vld [vmem:[%s3074_s25 + $0x238] sm:$0xff]  ;;  %801 = vst [vmem:[%s3079_s26 + $0x168] sm:$0xff] %v800_v45  ;;  %v806_v48 = vld [vmem:[%s3074_s25 + $0x300] sm:$0xff] }
  0x31   : > { %803 = vst [vmem:[%s3079_s26 + $0x170] sm:$0xff] %v802_v46  ;;  %805 = vst [vmem:[%s3079_s26 + $0x178] sm:$0xff] %v804_v47  ;;  %v808_v49 = vld [vmem:[%s3074_s25 + $0x308] sm:$0xff]  ;;  %v810_v50 = vld [vmem:[%s3074_s25 + $0x310] sm:$0xff] }
  0x32   : > { %807 = vst [vmem:[%s3079_s26 + $0x180] sm:$0xff] %v806_v48  ;;  %809 = vst [vmem:[%s3079_s26 + $0x188] sm:$0xff] %v808_v49  ;;  %v812_v51 = vld [vmem:[%s3074_s25 + $0x318] sm:$0xff]  ;;  %v814_v52 = vld [vmem:[%s3074_s25 + $0x320] sm:$0xff] }
  0x33   : > { %811 = vst [vmem:[%s3079_s26 + $0x190] sm:$0xff] %v810_v50  ;;  %v816_v53 = vld [vmem:[%s3074_s25 + $0x328] sm:$0xff]  ;;  %813 = vst [vmem:[%s3079_s26 + $0x198] sm:$0xff] %v812_v51  ;;  %v818_v54 = vld [vmem:[%s3074_s25 + $0x330] sm:$0xff] }
  0x34   : > { %815 = vst [vmem:[%s3079_s26 + $0x1a0] sm:$0xff] %v814_v52  ;;  %817 = vst [vmem:[%s3079_s26 + $0x1a8] sm:$0xff] %v816_v53  ;;  %v820_v55 = vld [vmem:[%s3074_s25 + $0x338] sm:$0xff]  ;;  %v822_v56 = vld [vmem:[%s3074_s25 + $0x340] sm:$0xff] }
  0x35   : > { %819 = vst [vmem:[%s3079_s26 + $0x1b0] sm:$0xff] %v818_v54  ;;  %821 = vst [vmem:[%s3079_s26 + $0x1b8] sm:$0xff] %v820_v55  ;;  %v824_v57 = vld [vmem:[%s3074_s25 + $0x348] sm:$0xff]  ;;  %v826_v58 = vld [vmem:[%s3074_s25 + $0x350] sm:$0xff] }
  0x36   : > { %823 = vst [vmem:[%s3079_s26 + $0x1c0] sm:$0xff] %v822_v56  ;;  %v828_v59 = vld [vmem:[%s3074_s25 + $0x358] sm:$0xff]  ;;  %825 = vst [vmem:[%s3079_s26 + $0x1c8] sm:$0xff] %v824_v57  ;;  %v830_v60 = vld [vmem:[%s3074_s25 + $0x360] sm:$0xff] }
  0x37   : > { %827 = vst [vmem:[%s3079_s26 + $0x1d0] sm:$0xff] %v826_v58  ;;  %829 = vst [vmem:[%s3079_s26 + $0x1d8] sm:$0xff] %v828_v59  ;;  %v832_v61 = vld [vmem:[%s3074_s25 + $0x368] sm:$0xff]  ;;  %v834_v62 = vld [vmem:[%s3074_s25 + $0x370] sm:$0xff] }
  0x38   : > { %831 = vst [vmem:[%s3079_s26 + $0x1e0] sm:$0xff] %v830_v60  ;;  %833 = vst [vmem:[%s3079_s26 + $0x1e8] sm:$0xff] %v832_v61  ;;  %v836_v63 = vld [vmem:[%s3074_s25 + $0x378] sm:$0xff]  ;;  %v838_v0 = vld [vmem:[%s3074_s25 + $0x380] sm:$0xff] }
  0x39   : > { %835 = vst [vmem:[%s3079_s26 + $0x1f0] sm:$0xff] %v834_v62  ;;  %v840_v1 = vld [vmem:[%s3074_s25 + $0x388] sm:$0xff]  ;;  %837 = vst [vmem:[%s3079_s26 + $0x1f8] sm:$0xff] %v836_v63  ;;  %v842_v2 = vld [vmem:[%s3074_s25 + $0x390] sm:$0xff] }
  0x3a   : > { %839 = vst [vmem:[%s3079_s26 + $0x200] sm:$0xff] %v838_v0  ;;  %841 = vst [vmem:[%s3079_s26 + $0x208] sm:$0xff] %v840_v1  ;;  %v844_v3 = vld [vmem:[%s3074_s25 + $0x398] sm:$0xff]  ;;  %v846_v4 = vld [vmem:[%s3074_s25 + $0x3a0] sm:$0xff] }
  0x3b   : > { %843 = vst [vmem:[%s3079_s26 + $0x210] sm:$0xff] %v842_v2  ;;  %845 = vst [vmem:[%s3079_s26 + $0x218] sm:$0xff] %v844_v3  ;;  %v848_v5 = vld [vmem:[%s3074_s25 + $0x3a8] sm:$0xff]  ;;  %v850_v6 = vld [vmem:[%s3074_s25 + $0x3b0] sm:$0xff] }
  0x3c   : > { %847 = vst [vmem:[%s3079_s26 + $0x220] sm:$0xff] %v846_v4  ;;  %v852_v7 = vld [vmem:[%s3074_s25 + $0x3b8] sm:$0xff]  ;;  %849 = vst [vmem:[%s3079_s26 + $0x228] sm:$0xff] %v848_v5  ;;  %v854_v8 = vld [vmem:[%s3074_s25 + $0x480] sm:$0xff] }
  0x3d   : > { %851 = vst [vmem:[%s3079_s26 + $0x230] sm:$0xff] %v850_v6  ;;  %853 = vst [vmem:[%s3079_s26 + $0x238] sm:$0xff] %v852_v7  ;;  %v856_v9 = vld [vmem:[%s3074_s25 + $0x488] sm:$0xff]  ;;  %v858_v10 = vld [vmem:[%s3074_s25 + $0x490] sm:$0xff] }
  0x3e   : > { %855 = vst [vmem:[%s3079_s26 + $0x240] sm:$0xff] %v854_v8  ;;  %857 = vst [vmem:[%s3079_s26 + $0x248] sm:$0xff] %v856_v9  ;;  %v860_v11 = vld [vmem:[%s3074_s25 + $0x498] sm:$0xff]  ;;  %v862_v12 = vld [vmem:[%s3074_s25 + $0x4a0] sm:$0xff] }
  0x3f   : > { %859 = vst [vmem:[%s3079_s26 + $0x250] sm:$0xff] %v858_v10  ;;  %v864_v13 = vld [vmem:[%s3074_s25 + $0x4a8] sm:$0xff]  ;;  %861 = vst [vmem:[%s3079_s26 + $0x258] sm:$0xff] %v860_v11  ;;  %v866_v14 = vld [vmem:[%s3074_s25 + $0x4b0] sm:$0xff] }
  0x40   : > { %863 = vst [vmem:[%s3079_s26 + $0x260] sm:$0xff] %v862_v12  ;;  %865 = vst [vmem:[%s3079_s26 + $0x268] sm:$0xff] %v864_v13  ;;  %v868_v15 = vld [vmem:[%s3074_s25 + $0x4b8] sm:$0xff]  ;;  %v870_v16 = vld [vmem:[%s3074_s25 + $0x4c0] sm:$0xff] }
  0x41   : > { %867 = vst [vmem:[%s3079_s26 + $0x270] sm:$0xff] %v866_v14  ;;  %869 = vst [vmem:[%s3079_s26 + $0x278] sm:$0xff] %v868_v15  ;;  %v872_v17 = vld [vmem:[%s3074_s25 + $0x4c8] sm:$0xff]  ;;  %v874_v18 = vld [vmem:[%s3074_s25 + $0x4d0] sm:$0xff] }
  0x42   : > { %871 = vst [vmem:[%s3079_s26 + $0x280] sm:$0xff] %v870_v16  ;;  %v876_v19 = vld [vmem:[%s3074_s25 + $0x4d8] sm:$0xff]  ;;  %873 = vst [vmem:[%s3079_s26 + $0x288] sm:$0xff] %v872_v17  ;;  %v878_v20 = vld [vmem:[%s3074_s25 + $0x4e0] sm:$0xff] }
  0x43   : > { %875 = vst [vmem:[%s3079_s26 + $0x290] sm:$0xff] %v874_v18  ;;  %877 = vst [vmem:[%s3079_s26 + $0x298] sm:$0xff] %v876_v19  ;;  %v880_v21 = vld [vmem:[%s3074_s25 + $0x4e8] sm:$0xff]  ;;  %v882_v22 = vld [vmem:[%s3074_s25 + $0x4f0] sm:$0xff] }
  0x44   : > { %879 = vst [vmem:[%s3079_s26 + $0x2a0] sm:$0xff] %v878_v20  ;;  %881 = vst [vmem:[%s3079_s26 + $0x2a8] sm:$0xff] %v880_v21  ;;  %v884_v23 = vld [vmem:[%s3074_s25 + $0x4f8] sm:$0xff]  ;;  %v886_v24 = vld [vmem:[%s3074_s25 + $0x500] sm:$0xff] }
  0x45   : > { %883 = vst [vmem:[%s3079_s26 + $0x2b0] sm:$0xff] %v882_v22  ;;  %v888_v25 = vld [vmem:[%s3074_s25 + $0x508] sm:$0xff]  ;;  %885 = vst [vmem:[%s3079_s26 + $0x2b8] sm:$0xff] %v884_v23  ;;  %v890_v26 = vld [vmem:[%s3074_s25 + $0x510] sm:$0xff] }
  0x46   : > { %887 = vst [vmem:[%s3079_s26 + $0x2c0] sm:$0xff] %v886_v24  ;;  %889 = vst [vmem:[%s3079_s26 + $0x2c8] sm:$0xff] %v888_v25  ;;  %v892_v27 = vld [vmem:[%s3074_s25 + $0x518] sm:$0xff]  ;;  %v894_v28 = vld [vmem:[%s3074_s25 + $0x520] sm:$0xff] }
  0x47   : > { %891 = vst [vmem:[%s3079_s26 + $0x2d0] sm:$0xff] %v890_v26  ;;  %893 = vst [vmem:[%s3079_s26 + $0x2d8] sm:$0xff] %v892_v27  ;;  %v896_v29 = vld [vmem:[%s3074_s25 + $0x528] sm:$0xff]  ;;  %v898_v30 = vld [vmem:[%s3074_s25 + $0x530] sm:$0xff] }
  0x48   : > { %895 = vst [vmem:[%s3079_s26 + $0x2e0] sm:$0xff] %v894_v28  ;;  %v900_v31 = vld [vmem:[%s3074_s25 + $0x538] sm:$0xff]  ;;  %897 = vst [vmem:[%s3079_s26 + $0x2e8] sm:$0xff] %v896_v29  ;;  %v902_v32 = vld [vmem:[%s3074_s25 + $0x600] sm:$0xff] }
  0x49   : > { %899 = vst [vmem:[%s3079_s26 + $0x2f0] sm:$0xff] %v898_v30  ;;  %901 = vst [vmem:[%s3079_s26 + $0x2f8] sm:$0xff] %v900_v31  ;;  %v904_v33 = vld [vmem:[%s3074_s25 + $0x608] sm:$0xff]  ;;  %v906_v34 = vld [vmem:[%s3074_s25 + $0x610] sm:$0xff] }
  0x4a   : > { %903 = vst [vmem:[%s3079_s26 + $0x300] sm:$0xff] %v902_v32  ;;  %905 = vst [vmem:[%s3079_s26 + $0x308] sm:$0xff] %v904_v33  ;;  %v908_v35 = vld [vmem:[%s3074_s25 + $0x618] sm:$0xff]  ;;  %v910_v36 = vld [vmem:[%s3074_s25 + $0x620] sm:$0xff] }
  0x4b   : > { %907 = vst [vmem:[%s3079_s26 + $0x310] sm:$0xff] %v906_v34  ;;  %v912_v37 = vld [vmem:[%s3074_s25 + $0x628] sm:$0xff]  ;;  %909 = vst [vmem:[%s3079_s26 + $0x318] sm:$0xff] %v908_v35  ;;  %v914_v38 = vld [vmem:[%s3074_s25 + $0x630] sm:$0xff] }
  0x4c   : > { %911 = vst [vmem:[%s3079_s26 + $0x320] sm:$0xff] %v910_v36  ;;  %913 = vst [vmem:[%s3079_s26 + $0x328] sm:$0xff] %v912_v37  ;;  %v916_v39 = vld [vmem:[%s3074_s25 + $0x638] sm:$0xff]  ;;  %v918_v40 = vld [vmem:[%s3074_s25 + $0x640] sm:$0xff] }
  0x4d   : > { %915 = vst [vmem:[%s3079_s26 + $0x330] sm:$0xff] %v914_v38  ;;  %917 = vst [vmem:[%s3079_s26 + $0x338] sm:$0xff] %v916_v39  ;;  %v920_v41 = vld [vmem:[%s3074_s25 + $0x648] sm:$0xff]  ;;  %v922_v42 = vld [vmem:[%s3074_s25 + $0x650] sm:$0xff] }
  0x4e   : > { %919 = vst [vmem:[%s3079_s26 + $0x340] sm:$0xff] %v918_v40  ;;  %v924_v43 = vld [vmem:[%s3074_s25 + $0x658] sm:$0xff]  ;;  %921 = vst [vmem:[%s3079_s26 + $0x348] sm:$0xff] %v920_v41  ;;  %v926_v44 = vld [vmem:[%s3074_s25 + $0x660] sm:$0xff] }
  0x4f   : > { %923 = vst [vmem:[%s3079_s26 + $0x350] sm:$0xff] %v922_v42  ;;  %925 = vst [vmem:[%s3079_s26 + $0x358] sm:$0xff] %v924_v43  ;;  %v928_v45 = vld [vmem:[%s3074_s25 + $0x668] sm:$0xff]  ;;  %v930_v46 = vld [vmem:[%s3074_s25 + $0x670] sm:$0xff] }
  0x50   : > { %927 = vst [vmem:[%s3079_s26 + $0x360] sm:$0xff] %v926_v44  ;;  %929 = vst [vmem:[%s3079_s26 + $0x368] sm:$0xff] %v928_v45  ;;  %v932_v47 = vld [vmem:[%s3074_s25 + $0x678] sm:$0xff]  ;;  %v934_v48 = vld [vmem:[%s3074_s25 + $0x680] sm:$0xff] }
  0x51   : > { %931 = vst [vmem:[%s3079_s26 + $0x370] sm:$0xff] %v930_v46  ;;  %v936_v49 = vld [vmem:[%s3074_s25 + $0x688] sm:$0xff]  ;;  %933 = vst [vmem:[%s3079_s26 + $0x378] sm:$0xff] %v932_v47  ;;  %v938_v50 = vld [vmem:[%s3074_s25 + $0x690] sm:$0xff] }
  0x52   : > { %935 = vst [vmem:[%s3079_s26 + $0x380] sm:$0xff] %v934_v48  ;;  %937 = vst [vmem:[%s3079_s26 + $0x388] sm:$0xff] %v936_v49  ;;  %v940_v51 = vld [vmem:[%s3074_s25 + $0x698] sm:$0xff]  ;;  %v942_v52 = vld [vmem:[%s3074_s25 + $0x6a0] sm:$0xff] }
  0x53   : > { %939 = vst [vmem:[%s3079_s26 + $0x390] sm:$0xff] %v938_v50  ;;  %941 = vst [vmem:[%s3079_s26 + $0x398] sm:$0xff] %v940_v51  ;;  %v944_v53 = vld [vmem:[%s3074_s25 + $0x6a8] sm:$0xff]  ;;  %v946_v54 = vld [vmem:[%s3074_s25 + $0x6b0] sm:$0xff] }
  0x54   : > { %943 = vst [vmem:[%s3079_s26 + $0x3a0] sm:$0xff] %v942_v52  ;;  %v948_v55 = vld [vmem:[%s3074_s25 + $0x6b8] sm:$0xff]  ;;  %945 = vst [vmem:[%s3079_s26 + $0x3a8] sm:$0xff] %v944_v53  ;;  %v950_v56 = vld [vmem:[%s3074_s25 + $0x780] sm:$0xff] }
  0x55   : > { %947 = vst [vmem:[%s3079_s26 + $0x3b0] sm:$0xff] %v946_v54  ;;  %949 = vst [vmem:[%s3079_s26 + $0x3b8] sm:$0xff] %v948_v55  ;;  %v952_v57 = vld [vmem:[%s3074_s25 + $0x788] sm:$0xff]  ;;  %v954_v58 = vld [vmem:[%s3074_s25 + $0x790] sm:$0xff] }
  0x56   : > { %951 = vst [vmem:[%s3079_s26 + $0x3c0] sm:$0xff] %v950_v56  ;;  %953 = vst [vmem:[%s3079_s26 + $0x3c8] sm:$0xff] %v952_v57  ;;  %v956_v59 = vld [vmem:[%s3074_s25 + $0x798] sm:$0xff]  ;;  %v958_v60 = vld [vmem:[%s3074_s25 + $0x7a0] sm:$0xff] }
  0x57   : > { %955 = vst [vmem:[%s3079_s26 + $0x3d0] sm:$0xff] %v954_v58  ;;  %v960_v61 = vld [vmem:[%s3074_s25 + $0x7a8] sm:$0xff]  ;;  %957 = vst [vmem:[%s3079_s26 + $0x3d8] sm:$0xff] %v956_v59  ;;  %v962_v62 = vld [vmem:[%s3074_s25 + $0x7b0] sm:$0xff] }
  0x58   : > { %959 = vst [vmem:[%s3079_s26 + $0x3e0] sm:$0xff] %v958_v60  ;;  %961 = vst [vmem:[%s3079_s26 + $0x3e8] sm:$0xff] %v960_v61  ;;  %v964_v63 = vld [vmem:[%s3074_s25 + $0x7b8] sm:$0xff]  ;;  %v966_v0 = vld [vmem:[%s3074_s25 + $0x7c0] sm:$0xff] }
  0x59   : > { %963 = vst [vmem:[%s3079_s26 + $0x3f0] sm:$0xff] %v962_v62  ;;  %965 = vst [vmem:[%s3079_s26 + $0x3f8] sm:$0xff] %v964_v63  ;;  %v968_v1 = vld [vmem:[%s3074_s25 + $0x7c8] sm:$0xff]  ;;  %v970_v2 = vld [vmem:[%s3074_s25 + $0x7d0] sm:$0xff] }
  0x5a   : > { %967 = vst [vmem:[%s3079_s26 + $0x400] sm:$0xff] %v966_v0  ;;  %v972_v3 = vld [vmem:[%s3074_s25 + $0x7d8] sm:$0xff]  ;;  %969 = vst [vmem:[%s3079_s26 + $0x408] sm:$0xff] %v968_v1  ;;  %v974_v4 = vld [vmem:[%s3074_s25 + $0x7e0] sm:$0xff] }
  0x5b   : > { %971 = vst [vmem:[%s3079_s26 + $0x410] sm:$0xff] %v970_v2  ;;  %973 = vst [vmem:[%s3079_s26 + $0x418] sm:$0xff] %v972_v3  ;;  %v976_v5 = vld [vmem:[%s3074_s25 + $0x7e8] sm:$0xff]  ;;  %v978_v6 = vld [vmem:[%s3074_s25 + $0x7f0] sm:$0xff] }
  0x5c   : > { %975 = vst [vmem:[%s3079_s26 + $0x420] sm:$0xff] %v974_v4  ;;  %977 = vst [vmem:[%s3079_s26 + $0x428] sm:$0xff] %v976_v5  ;;  %v980_v7 = vld [vmem:[%s3074_s25 + $0x7f8] sm:$0xff]  ;;  %v982_v8 = vld [vmem:[%s3074_s25 + $0x800] sm:$0xff] }
  0x5d   : > { %979 = vst [vmem:[%s3079_s26 + $0x430] sm:$0xff] %v978_v6  ;;  %v984_v9 = vld [vmem:[%s3074_s25 + $0x808] sm:$0xff]  ;;  %981 = vst [vmem:[%s3079_s26 + $0x438] sm:$0xff] %v980_v7  ;;  %v986_v10 = vld [vmem:[%s3074_s25 + $0x810] sm:$0xff] }
  0x5e   : > { %983 = vst [vmem:[%s3079_s26 + $0x440] sm:$0xff] %v982_v8  ;;  %985 = vst [vmem:[%s3079_s26 + $0x448] sm:$0xff] %v984_v9  ;;  %v988_v11 = vld [vmem:[%s3074_s25 + $0x818] sm:$0xff]  ;;  %v990_v12 = vld [vmem:[%s3074_s25 + $0x820] sm:$0xff] }
  0x5f   : > { %987 = vst [vmem:[%s3079_s26 + $0x450] sm:$0xff] %v986_v10  ;;  %989 = vst [vmem:[%s3079_s26 + $0x458] sm:$0xff] %v988_v11  ;;  %v992_v13 = vld [vmem:[%s3074_s25 + $0x828] sm:$0xff]  ;;  %v994_v14 = vld [vmem:[%s3074_s25 + $0x830] sm:$0xff] }
  0x60   : > { %991 = vst [vmem:[%s3079_s26 + $0x460] sm:$0xff] %v990_v12  ;;  %v996_v15 = vld [vmem:[%s3074_s25 + $0x838] sm:$0xff]  ;;  %993 = vst [vmem:[%s3079_s26 + $0x468] sm:$0xff] %v992_v13  ;;  %v998_v16 = vld [vmem:[%s3074_s25 + $0x900] sm:$0xff] }
  0x61   : > { %995 = vst [vmem:[%s3079_s26 + $0x470] sm:$0xff] %v994_v14  ;;  %997 = vst [vmem:[%s3079_s26 + $0x478] sm:$0xff] %v996_v15  ;;  %v1000_v17 = vld [vmem:[%s3074_s25 + $0x908] sm:$0xff]  ;;  %v1002_v18 = vld [vmem:[%s3074_s25 + $0x910] sm:$0xff] }
  0x62   : > { %999 = vst [vmem:[%s3079_s26 + $0x480] sm:$0xff] %v998_v16  ;;  %1001 = vst [vmem:[%s3079_s26 + $0x488] sm:$0xff] %v1000_v17  ;;  %v1004_v19 = vld [vmem:[%s3074_s25 + $0x918] sm:$0xff]  ;;  %v1006_v20 = vld [vmem:[%s3074_s25 + $0x920] sm:$0xff] }
  0x63   : > { %1003 = vst [vmem:[%s3079_s26 + $0x490] sm:$0xff] %v1002_v18  ;;  %v1008_v21 = vld [vmem:[%s3074_s25 + $0x928] sm:$0xff]  ;;  %1005 = vst [vmem:[%s3079_s26 + $0x498] sm:$0xff] %v1004_v19  ;;  %v1010_v22 = vld [vmem:[%s3074_s25 + $0x930] sm:$0xff] }
  0x64   : > { %1007 = vst [vmem:[%s3079_s26 + $0x4a0] sm:$0xff] %v1006_v20  ;;  %1009 = vst [vmem:[%s3079_s26 + $0x4a8] sm:$0xff] %v1008_v21  ;;  %v1012_v23 = vld [vmem:[%s3074_s25 + $0x938] sm:$0xff]  ;;  %v1014_v24 = vld [vmem:[%s3074_s25 + $0x940] sm:$0xff] }
  0x65   : > { %1011 = vst [vmem:[%s3079_s26 + $0x4b0] sm:$0xff] %v1010_v22  ;;  %1013 = vst [vmem:[%s3079_s26 + $0x4b8] sm:$0xff] %v1012_v23  ;;  %v1016_v25 = vld [vmem:[%s3074_s25 + $0x948] sm:$0xff]  ;;  %v1018_v26 = vld [vmem:[%s3074_s25 + $0x950] sm:$0xff] }
  0x66   : > { %1015 = vst [vmem:[%s3079_s26 + $0x4c0] sm:$0xff] %v1014_v24  ;;  %v1020_v27 = vld [vmem:[%s3074_s25 + $0x958] sm:$0xff]  ;;  %1017 = vst [vmem:[%s3079_s26 + $0x4c8] sm:$0xff] %v1016_v25  ;;  %v1022_v28 = vld [vmem:[%s3074_s25 + $0x960] sm:$0xff] }
  0x67   : > { %1019 = vst [vmem:[%s3079_s26 + $0x4d0] sm:$0xff] %v1018_v26  ;;  %1021 = vst [vmem:[%s3079_s26 + $0x4d8] sm:$0xff] %v1020_v27  ;;  %v1024_v29 = vld [vmem:[%s3074_s25 + $0x968] sm:$0xff]  ;;  %v1026_v30 = vld [vmem:[%s3074_s25 + $0x970] sm:$0xff] }
  0x68   : > { %1023 = vst [vmem:[%s3079_s26 + $0x4e0] sm:$0xff] %v1022_v28  ;;  %1025 = vst [vmem:[%s3079_s26 + $0x4e8] sm:$0xff] %v1024_v29  ;;  %v1028_v31 = vld [vmem:[%s3074_s25 + $0x978] sm:$0xff]  ;;  %v1030_v32 = vld [vmem:[%s3074_s25 + $0x980] sm:$0xff] }
  0x69   : > { %1027 = vst [vmem:[%s3079_s26 + $0x4f0] sm:$0xff] %v1026_v30  ;;  %v1032_v33 = vld [vmem:[%s3074_s25 + $0x988] sm:$0xff]  ;;  %1029 = vst [vmem:[%s3079_s26 + $0x4f8] sm:$0xff] %v1028_v31  ;;  %v1034_v34 = vld [vmem:[%s3074_s25 + $0x990] sm:$0xff] }
  0x6a   : > { %1031 = vst [vmem:[%s3079_s26 + $0x500] sm:$0xff] %v1030_v32  ;;  %1033 = vst [vmem:[%s3079_s26 + $0x508] sm:$0xff] %v1032_v33  ;;  %v1036_v35 = vld [vmem:[%s3074_s25 + $0x998] sm:$0xff]  ;;  %v1038_v36 = vld [vmem:[%s3074_s25 + $0x9a0] sm:$0xff] }
  0x6b   : > { %1035 = vst [vmem:[%s3079_s26 + $0x510] sm:$0xff] %v1034_v34  ;;  %1037 = vst [vmem:[%s3079_s26 + $0x518] sm:$0xff] %v1036_v35  ;;  %v1040_v37 = vld [vmem:[%s3074_s25 + $0x9a8] sm:$0xff]  ;;  %v1042_v38 = vld [vmem:[%s3074_s25 + $0x9b0] sm:$0xff] }
  0x6c   : > { %1039 = vst [vmem:[%s3079_s26 + $0x520] sm:$0xff] %v1038_v36  ;;  %v1044_v39 = vld [vmem:[%s3074_s25 + $0x9b8] sm:$0xff]  ;;  %1041 = vst [vmem:[%s3079_s26 + $0x528] sm:$0xff] %v1040_v37  ;;  %v1046_v40 = vld [vmem:[%s3074_s25 + $0xa80] sm:$0xff] }
  0x6d   : > { %1043 = vst [vmem:[%s3079_s26 + $0x530] sm:$0xff] %v1042_v38  ;;  %1045 = vst [vmem:[%s3079_s26 + $0x538] sm:$0xff] %v1044_v39  ;;  %v1048_v41 = vld [vmem:[%s3074_s25 + $0xa88] sm:$0xff]  ;;  %v1050_v42 = vld [vmem:[%s3074_s25 + $0xa90] sm:$0xff] }
  0x6e   : > { %1047 = vst [vmem:[%s3079_s26 + $0x540] sm:$0xff] %v1046_v40  ;;  %1049 = vst [vmem:[%s3079_s26 + $0x548] sm:$0xff] %v1048_v41  ;;  %v1052_v43 = vld [vmem:[%s3074_s25 + $0xa98] sm:$0xff]  ;;  %v1054_v44 = vld [vmem:[%s3074_s25 + $0xaa0] sm:$0xff] }
  0x6f   : > { %1051 = vst [vmem:[%s3079_s26 + $0x550] sm:$0xff] %v1050_v42  ;;  %v1056_v45 = vld [vmem:[%s3074_s25 + $0xaa8] sm:$0xff]  ;;  %1053 = vst [vmem:[%s3079_s26 + $0x558] sm:$0xff] %v1052_v43  ;;  %v1058_v46 = vld [vmem:[%s3074_s25 + $0xab0] sm:$0xff] }
  0x70   : > { %1055 = vst [vmem:[%s3079_s26 + $0x560] sm:$0xff] %v1054_v44  ;;  %1057 = vst [vmem:[%s3079_s26 + $0x568] sm:$0xff] %v1056_v45  ;;  %v1060_v47 = vld [vmem:[%s3074_s25 + $0xab8] sm:$0xff]  ;;  %v1062_v48 = vld [vmem:[%s3074_s25 + $0xac0] sm:$0xff] }
  0x71   : > { %1059 = vst [vmem:[%s3079_s26 + $0x570] sm:$0xff] %v1058_v46  ;;  %1061 = vst [vmem:[%s3079_s26 + $0x578] sm:$0xff] %v1060_v47  ;;  %v1064_v49 = vld [vmem:[%s3074_s25 + $0xac8] sm:$0xff]  ;;  %v1066_v50 = vld [vmem:[%s3074_s25 + $0xad0] sm:$0xff] }
  0x72   : > { %1063 = vst [vmem:[%s3079_s26 + $0x580] sm:$0xff] %v1062_v48  ;;  %v1068_v51 = vld [vmem:[%s3074_s25 + $0xad8] sm:$0xff]  ;;  %1065 = vst [vmem:[%s3079_s26 + $0x588] sm:$0xff] %v1064_v49  ;;  %v1070_v52 = vld [vmem:[%s3074_s25 + $0xae0] sm:$0xff] }
  0x73   : > { %1067 = vst [vmem:[%s3079_s26 + $0x590] sm:$0xff] %v1066_v50  ;;  %1069 = vst [vmem:[%s3079_s26 + $0x598] sm:$0xff] %v1068_v51  ;;  %v1072_v53 = vld [vmem:[%s3074_s25 + $0xae8] sm:$0xff]  ;;  %v1074_v54 = vld [vmem:[%s3074_s25 + $0xaf0] sm:$0xff] }
  0x74   : > { %1071 = vst [vmem:[%s3079_s26 + $0x5a0] sm:$0xff] %v1070_v52  ;;  %1073 = vst [vmem:[%s3079_s26 + $0x5a8] sm:$0xff] %v1072_v53  ;;  %v1076_v55 = vld [vmem:[%s3074_s25 + $0xaf8] sm:$0xff]  ;;  %v1078_v56 = vld [vmem:[%s3074_s25 + $0xb00] sm:$0xff] }
  0x75   : > { %1075 = vst [vmem:[%s3079_s26 + $0x5b0] sm:$0xff] %v1074_v54  ;;  %v1080_v57 = vld [vmem:[%s3074_s25 + $0xb08] sm:$0xff]  ;;  %1077 = vst [vmem:[%s3079_s26 + $0x5b8] sm:$0xff] %v1076_v55  ;;  %v1082_v58 = vld [vmem:[%s3074_s25 + $0xb10] sm:$0xff] }
  0x76   : > { %1079 = vst [vmem:[%s3079_s26 + $0x5c0] sm:$0xff] %v1078_v56  ;;  %1081 = vst [vmem:[%s3079_s26 + $0x5c8] sm:$0xff] %v1080_v57  ;;  %v1084_v59 = vld [vmem:[%s3074_s25 + $0xb18] sm:$0xff]  ;;  %v1086_v60 = vld [vmem:[%s3074_s25 + $0xb20] sm:$0xff] }
  0x77   : > { %1083 = vst [vmem:[%s3079_s26 + $0x5d0] sm:$0xff] %v1082_v58  ;;  %1085 = vst [vmem:[%s3079_s26 + $0x5d8] sm:$0xff] %v1084_v59  ;;  %v1088_v61 = vld [vmem:[%s3074_s25 + $0xb28] sm:$0xff]  ;;  %v1090_v62 = vld [vmem:[%s3074_s25 + $0xb30] sm:$0xff] }
  0x78   : > { %1087 = vst [vmem:[%s3079_s26 + $0x5e0] sm:$0xff] %v1086_v60  ;;  %v1092_v63 = vld [vmem:[%s3074_s25 + $0xb38] sm:$0xff]  ;;  %1089 = vst [vmem:[%s3079_s26 + $0x5e8] sm:$0xff] %v1088_v61  ;;  %v1094_v0 = vld [vmem:[%s3074_s25 + $0xc00] sm:$0xff] }
  0x79   : > { %1091 = vst [vmem:[%s3079_s26 + $0x5f0] sm:$0xff] %v1090_v62  ;;  %1093 = vst [vmem:[%s3079_s26 + $0x5f8] sm:$0xff] %v1092_v63  ;;  %v1096_v1 = vld [vmem:[%s3074_s25 + $0xc08] sm:$0xff]  ;;  %v1098_v2 = vld [vmem:[%s3074_s25 + $0xc10] sm:$0xff] }
  0x7a   : > { %1095 = vst [vmem:[%s3079_s26 + $0x600] sm:$0xff] %v1094_v0  ;;  %1097 = vst [vmem:[%s3079_s26 + $0x608] sm:$0xff] %v1096_v1  ;;  %v1100_v3 = vld [vmem:[%s3074_s25 + $0xc18] sm:$0xff]  ;;  %v1102_v4 = vld [vmem:[%s3074_s25 + $0xc20] sm:$0xff] }
  0x7b   : > { %1099 = vst [vmem:[%s3079_s26 + $0x610] sm:$0xff] %v1098_v2  ;;  %v1104_v5 = vld [vmem:[%s3074_s25 + $0xc28] sm:$0xff]  ;;  %1101 = vst [vmem:[%s3079_s26 + $0x618] sm:$0xff] %v1100_v3  ;;  %v1106_v6 = vld [vmem:[%s3074_s25 + $0xc30] sm:$0xff] }
  0x7c   : > { %1103 = vst [vmem:[%s3079_s26 + $0x620] sm:$0xff] %v1102_v4  ;;  %1105 = vst [vmem:[%s3079_s26 + $0x628] sm:$0xff] %v1104_v5  ;;  %v1108_v7 = vld [vmem:[%s3074_s25 + $0xc38] sm:$0xff]  ;;  %v1110_v8 = vld [vmem:[%s3074_s25 + $0xc40] sm:$0xff] }
  0x7d   : > { %1107 = vst [vmem:[%s3079_s26 + $0x630] sm:$0xff] %v1106_v6  ;;  %1109 = vst [vmem:[%s3079_s26 + $0x638] sm:$0xff] %v1108_v7  ;;  %v1112_v9 = vld [vmem:[%s3074_s25 + $0xc48] sm:$0xff]  ;;  %v1114_v10 = vld [vmem:[%s3074_s25 + $0xc50] sm:$0xff] }
  0x7e   : > { %1111 = vst [vmem:[%s3079_s26 + $0x640] sm:$0xff] %v1110_v8  ;;  %v1116_v11 = vld [vmem:[%s3074_s25 + $0xc58] sm:$0xff]  ;;  %1113 = vst [vmem:[%s3079_s26 + $0x648] sm:$0xff] %v1112_v9  ;;  %v1118_v12 = vld [vmem:[%s3074_s25 + $0xc60] sm:$0xff] }
  0x7f   : > { %1115 = vst [vmem:[%s3079_s26 + $0x650] sm:$0xff] %v1114_v10  ;;  %1117 = vst [vmem:[%s3079_s26 + $0x658] sm:$0xff] %v1116_v11  ;;  %v1120_v13 = vld [vmem:[%s3074_s25 + $0xc68] sm:$0xff]  ;;  %v1122_v14 = vld [vmem:[%s3074_s25 + $0xc70] sm:$0xff] }
  0x80   : > { %1119 = vst [vmem:[%s3079_s26 + $0x660] sm:$0xff] %v1118_v12  ;;  %1121 = vst [vmem:[%s3079_s26 + $0x668] sm:$0xff] %v1120_v13  ;;  %v1124_v15 = vld [vmem:[%s3074_s25 + $0xc78] sm:$0xff]  ;;  %v1126_v16 = vld [vmem:[%s3074_s25 + $0xc80] sm:$0xff] }
  0x81   : > { %1123 = vst [vmem:[%s3079_s26 + $0x670] sm:$0xff] %v1122_v14  ;;  %v1128_v17 = vld [vmem:[%s3074_s25 + $0xc88] sm:$0xff]  ;;  %1125 = vst [vmem:[%s3079_s26 + $0x678] sm:$0xff] %v1124_v15  ;;  %v1130_v18 = vld [vmem:[%s3074_s25 + $0xc90] sm:$0xff] }
  0x82   : > { %1127 = vst [vmem:[%s3079_s26 + $0x680] sm:$0xff] %v1126_v16  ;;  %1129 = vst [vmem:[%s3079_s26 + $0x688] sm:$0xff] %v1128_v17  ;;  %v1132_v19 = vld [vmem:[%s3074_s25 + $0xc98] sm:$0xff]  ;;  %v1134_v20 = vld [vmem:[%s3074_s25 + $0xca0] sm:$0xff] }
  0x83   : > { %1131 = vst [vmem:[%s3079_s26 + $0x690] sm:$0xff] %v1130_v18  ;;  %1133 = vst [vmem:[%s3079_s26 + $0x698] sm:$0xff] %v1132_v19  ;;  %v1136_v21 = vld [vmem:[%s3074_s25 + $0xca8] sm:$0xff]  ;;  %v1138_v22 = vld [vmem:[%s3074_s25 + $0xcb0] sm:$0xff] }
  0x84   : > { %1135 = vst [vmem:[%s3079_s26 + $0x6a0] sm:$0xff] %v1134_v20  ;;  %v1140_v23 = vld [vmem:[%s3074_s25 + $0xcb8] sm:$0xff]  ;;  %1137 = vst [vmem:[%s3079_s26 + $0x6a8] sm:$0xff] %v1136_v21  ;;  %v1142_v24 = vld [vmem:[%s3074_s25 + $0xd80] sm:$0xff] }
  0x85   : > { %1139 = vst [vmem:[%s3079_s26 + $0x6b0] sm:$0xff] %v1138_v22  ;;  %1141 = vst [vmem:[%s3079_s26 + $0x6b8] sm:$0xff] %v1140_v23  ;;  %v1144_v25 = vld [vmem:[%s3074_s25 + $0xd88] sm:$0xff]  ;;  %v1146_v26 = vld [vmem:[%s3074_s25 + $0xd90] sm:$0xff] }
  0x86   : > { %1143 = vst [vmem:[%s3079_s26 + $0x6c0] sm:$0xff] %v1142_v24  ;;  %1145 = vst [vmem:[%s3079_s26 + $0x6c8] sm:$0xff] %v1144_v25  ;;  %v1148_v27 = vld [vmem:[%s3074_s25 + $0xd98] sm:$0xff]  ;;  %v1150_v28 = vld [vmem:[%s3074_s25 + $0xda0] sm:$0xff] }
  0x87   : > { %1147 = vst [vmem:[%s3079_s26 + $0x6d0] sm:$0xff] %v1146_v26  ;;  %v1152_v29 = vld [vmem:[%s3074_s25 + $0xda8] sm:$0xff]  ;;  %1149 = vst [vmem:[%s3079_s26 + $0x6d8] sm:$0xff] %v1148_v27  ;;  %v1154_v30 = vld [vmem:[%s3074_s25 + $0xdb0] sm:$0xff] }
  0x88   : > { %1151 = vst [vmem:[%s3079_s26 + $0x6e0] sm:$0xff] %v1150_v28  ;;  %1153 = vst [vmem:[%s3079_s26 + $0x6e8] sm:$0xff] %v1152_v29  ;;  %v1156_v31 = vld [vmem:[%s3074_s25 + $0xdb8] sm:$0xff]  ;;  %v1158_v32 = vld [vmem:[%s3074_s25 + $0xdc0] sm:$0xff] }
  0x89   : > { %1155 = vst [vmem:[%s3079_s26 + $0x6f0] sm:$0xff] %v1154_v30  ;;  %1157 = vst [vmem:[%s3079_s26 + $0x6f8] sm:$0xff] %v1156_v31  ;;  %v1160_v33 = vld [vmem:[%s3074_s25 + $0xdc8] sm:$0xff]  ;;  %v1162_v34 = vld [vmem:[%s3074_s25 + $0xdd0] sm:$0xff] }
  0x8a   : > { %1159 = vst [vmem:[%s3079_s26 + $0x700] sm:$0xff] %v1158_v32  ;;  %v1164_v35 = vld [vmem:[%s3074_s25 + $0xdd8] sm:$0xff]  ;;  %1161 = vst [vmem:[%s3079_s26 + $0x708] sm:$0xff] %v1160_v33  ;;  %v1166_v36 = vld [vmem:[%s3074_s25 + $0xde0] sm:$0xff] }
  0x8b   : > { %1163 = vst [vmem:[%s3079_s26 + $0x710] sm:$0xff] %v1162_v34  ;;  %1165 = vst [vmem:[%s3079_s26 + $0x718] sm:$0xff] %v1164_v35  ;;  %v1168_v37 = vld [vmem:[%s3074_s25 + $0xde8] sm:$0xff]  ;;  %v1170_v38 = vld [vmem:[%s3074_s25 + $0xdf0] sm:$0xff] }
  0x8c   : > { %1167 = vst [vmem:[%s3079_s26 + $0x720] sm:$0xff] %v1166_v36  ;;  %1169 = vst [vmem:[%s3079_s26 + $0x728] sm:$0xff] %v1168_v37  ;;  %v1172_v39 = vld [vmem:[%s3074_s25 + $0xdf8] sm:$0xff]  ;;  %v1174_v40 = vld [vmem:[%s3074_s25 + $0xe00] sm:$0xff] }
  0x8d   : > { %1171 = vst [vmem:[%s3079_s26 + $0x730] sm:$0xff] %v1170_v38  ;;  %v1176_v41 = vld [vmem:[%s3074_s25 + $0xe08] sm:$0xff]  ;;  %1173 = vst [vmem:[%s3079_s26 + $0x738] sm:$0xff] %v1172_v39  ;;  %v1178_v42 = vld [vmem:[%s3074_s25 + $0xe10] sm:$0xff] }
  0x8e   : > { %1175 = vst [vmem:[%s3079_s26 + $0x740] sm:$0xff] %v1174_v40  ;;  %1177 = vst [vmem:[%s3079_s26 + $0x748] sm:$0xff] %v1176_v41  ;;  %v1180_v43 = vld [vmem:[%s3074_s25 + $0xe18] sm:$0xff]  ;;  %v1182_v44 = vld [vmem:[%s3074_s25 + $0xe20] sm:$0xff] }
  0x8f   : > { %1179 = vst [vmem:[%s3079_s26 + $0x750] sm:$0xff] %v1178_v42  ;;  %1181 = vst [vmem:[%s3079_s26 + $0x758] sm:$0xff] %v1180_v43  ;;  %v1184_v45 = vld [vmem:[%s3074_s25 + $0xe28] sm:$0xff]  ;;  %v1186_v46 = vld [vmem:[%s3074_s25 + $0xe30] sm:$0xff] }
  0x90   : > { %1183 = vst [vmem:[%s3079_s26 + $0x760] sm:$0xff] %v1182_v44  ;;  %v1188_v47 = vld [vmem:[%s3074_s25 + $0xe38] sm:$0xff]  ;;  %1185 = vst [vmem:[%s3079_s26 + $0x768] sm:$0xff] %v1184_v45  ;;  %v1190_v48 = vld [vmem:[%s3074_s25 + $0xf00] sm:$0xff] }
  0x91   : > { %1187 = vst [vmem:[%s3079_s26 + $0x770] sm:$0xff] %v1186_v46  ;;  %1189 = vst [vmem:[%s3079_s26 + $0x778] sm:$0xff] %v1188_v47  ;;  %v1192_v49 = vld [vmem:[%s3074_s25 + $0xf08] sm:$0xff]  ;;  %v1194_v50 = vld [vmem:[%s3074_s25 + $0xf10] sm:$0xff] }
  0x92   : > { %1191 = vst [vmem:[%s3079_s26 + $0x780] sm:$0xff] %v1190_v48  ;;  %1193 = vst [vmem:[%s3079_s26 + $0x788] sm:$0xff] %v1192_v49  ;;  %v1196_v51 = vld [vmem:[%s3074_s25 + $0xf18] sm:$0xff]  ;;  %v1198_v52 = vld [vmem:[%s3074_s25 + $0xf20] sm:$0xff] }
  0x93   : > { %1195 = vst [vmem:[%s3079_s26 + $0x790] sm:$0xff] %v1194_v50  ;;  %v1200_v53 = vld [vmem:[%s3074_s25 + $0xf28] sm:$0xff]  ;;  %1197 = vst [vmem:[%s3079_s26 + $0x798] sm:$0xff] %v1196_v51  ;;  %v1202_v54 = vld [vmem:[%s3074_s25 + $0xf30] sm:$0xff] }
  0x94   : > { %1199 = vst [vmem:[%s3079_s26 + $0x7a0] sm:$0xff] %v1198_v52  ;;  %1201 = vst [vmem:[%s3079_s26 + $0x7a8] sm:$0xff] %v1200_v53  ;;  %v1204_v55 = vld [vmem:[%s3074_s25 + $0xf38] sm:$0xff]  ;;  %v1206_v56 = vld [vmem:[%s3074_s25 + $0xf40] sm:$0xff] }
  0x95   : > { %1203 = vst [vmem:[%s3079_s26 + $0x7b0] sm:$0xff] %v1202_v54  ;;  %1205 = vst [vmem:[%s3079_s26 + $0x7b8] sm:$0xff] %v1204_v55  ;;  %v1208_v57 = vld [vmem:[%s3074_s25 + $0xf48] sm:$0xff]  ;;  %v1210_v58 = vld [vmem:[%s3074_s25 + $0xf50] sm:$0xff] }
  0x96   : > { %1207 = vst [vmem:[%s3079_s26 + $0x7c0] sm:$0xff] %v1206_v56  ;;  %v1212_v59 = vld [vmem:[%s3074_s25 + $0xf58] sm:$0xff]  ;;  %1209 = vst [vmem:[%s3079_s26 + $0x7c8] sm:$0xff] %v1208_v57  ;;  %v1214_v60 = vld [vmem:[%s3074_s25 + $0xf60] sm:$0xff] }
  0x97   : > { %1211 = vst [vmem:[%s3079_s26 + $0x7d0] sm:$0xff] %v1210_v58  ;;  %1213 = vst [vmem:[%s3079_s26 + $0x7d8] sm:$0xff] %v1212_v59  ;;  %v1216_v61 = vld [vmem:[%s3074_s25 + $0xf68] sm:$0xff]  ;;  %v1218_v62 = vld [vmem:[%s3074_s25 + $0xf70] sm:$0xff] }
  0x98   : > { %1215 = vst [vmem:[%s3079_s26 + $0x7e0] sm:$0xff] %v1214_v60  ;;  %1217 = vst [vmem:[%s3079_s26 + $0x7e8] sm:$0xff] %v1216_v61  ;;  %v1220_v63 = vld [vmem:[%s3074_s25 + $0xf78] sm:$0xff]  ;;  %v1222_v0 = vld [vmem:[%s3074_s25 + $0xf80] sm:$0xff] }
  0x99   : > { %1219 = vst [vmem:[%s3079_s26 + $0x7f0] sm:$0xff] %v1218_v62  ;;  %v1224_v1 = vld [vmem:[%s3074_s25 + $0xf88] sm:$0xff]  ;;  %1221 = vst [vmem:[%s3079_s26 + $0x7f8] sm:$0xff] %v1220_v63  ;;  %v1226_v2 = vld [vmem:[%s3074_s25 + $0xf90] sm:$0xff] }
  0x9a   : > { %1223 = vst [vmem:[%s3079_s26 + $0x800] sm:$0xff] %v1222_v0  ;;  %1225 = vst [vmem:[%s3079_s26 + $0x808] sm:$0xff] %v1224_v1  ;;  %v1228_v3 = vld [vmem:[%s3074_s25 + $0xf98] sm:$0xff]  ;;  %v1230_v4 = vld [vmem:[%s3074_s25 + $0xfa0] sm:$0xff] }
  0x9b   : > { %1227 = vst [vmem:[%s3079_s26 + $0x810] sm:$0xff] %v1226_v2  ;;  %1229 = vst [vmem:[%s3079_s26 + $0x818] sm:$0xff] %v1228_v3  ;;  %v1232_v5 = vld [vmem:[%s3074_s25 + $0xfa8] sm:$0xff]  ;;  %v1234_v6 = vld [vmem:[%s3074_s25 + $0xfb0] sm:$0xff] }
  0x9c   : > { %1231 = vst [vmem:[%s3079_s26 + $0x820] sm:$0xff] %v1230_v4  ;;  %v1236_v7 = vld [vmem:[%s3074_s25 + $0xfb8] sm:$0xff]  ;;  %1233 = vst [vmem:[%s3079_s26 + $0x828] sm:$0xff] %v1232_v5  ;;  %v1238_v8 = vld [vmem:[%s3074_s25 + $0x1080] sm:$0xff] }
  0x9d   : > { %1235 = vst [vmem:[%s3079_s26 + $0x830] sm:$0xff] %v1234_v6  ;;  %1237 = vst [vmem:[%s3079_s26 + $0x838] sm:$0xff] %v1236_v7  ;;  %v1240_v9 = vld [vmem:[%s3074_s25 + $0x1088] sm:$0xff]  ;;  %v1242_v10 = vld [vmem:[%s3074_s25 + $0x1090] sm:$0xff] }
  0x9e   : > { %1239 = vst [vmem:[%s3079_s26 + $0x840] sm:$0xff] %v1238_v8  ;;  %1241 = vst [vmem:[%s3079_s26 + $0x848] sm:$0xff] %v1240_v9  ;;  %v1244_v11 = vld [vmem:[%s3074_s25 + $0x1098] sm:$0xff]  ;;  %v1246_v12 = vld [vmem:[%s3074_s25 + $0x10a0] sm:$0xff] }
  0x9f   : > { %1243 = vst [vmem:[%s3079_s26 + $0x850] sm:$0xff] %v1242_v10  ;;  %v1248_v13 = vld [vmem:[%s3074_s25 + $0x10a8] sm:$0xff]  ;;  %1245 = vst [vmem:[%s3079_s26 + $0x858] sm:$0xff] %v1244_v11  ;;  %v1250_v14 = vld [vmem:[%s3074_s25 + $0x10b0] sm:$0xff] }
  0xa0   : > { %1247 = vst [vmem:[%s3079_s26 + $0x860] sm:$0xff] %v1246_v12  ;;  %1249 = vst [vmem:[%s3079_s26 + $0x868] sm:$0xff] %v1248_v13  ;;  %v1252_v15 = vld [vmem:[%s3074_s25 + $0x10b8] sm:$0xff]  ;;  %v1254_v16 = vld [vmem:[%s3074_s25 + $0x10c0] sm:$0xff] }
  0xa1   : > { %1251 = vst [vmem:[%s3079_s26 + $0x870] sm:$0xff] %v1250_v14  ;;  %1253 = vst [vmem:[%s3079_s26 + $0x878] sm:$0xff] %v1252_v15  ;;  %v1256_v17 = vld [vmem:[%s3074_s25 + $0x10c8] sm:$0xff]  ;;  %v1258_v18 = vld [vmem:[%s3074_s25 + $0x10d0] sm:$0xff] }
  0xa2   : > { %1255 = vst [vmem:[%s3079_s26 + $0x880] sm:$0xff] %v1254_v16  ;;  %v1260_v19 = vld [vmem:[%s3074_s25 + $0x10d8] sm:$0xff]  ;;  %1257 = vst [vmem:[%s3079_s26 + $0x888] sm:$0xff] %v1256_v17  ;;  %v1262_v20 = vld [vmem:[%s3074_s25 + $0x10e0] sm:$0xff] }
  0xa3   : > { %1259 = vst [vmem:[%s3079_s26 + $0x890] sm:$0xff] %v1258_v18  ;;  %1261 = vst [vmem:[%s3079_s26 + $0x898] sm:$0xff] %v1260_v19  ;;  %v1264_v21 = vld [vmem:[%s3074_s25 + $0x10e8] sm:$0xff]  ;;  %v1266_v22 = vld [vmem:[%s3074_s25 + $0x10f0] sm:$0xff] }
  0xa4   : > { %1263 = vst [vmem:[%s3079_s26 + $0x8a0] sm:$0xff] %v1262_v20  ;;  %1265 = vst [vmem:[%s3079_s26 + $0x8a8] sm:$0xff] %v1264_v21  ;;  %v1268_v23 = vld [vmem:[%s3074_s25 + $0x10f8] sm:$0xff]  ;;  %v1270_v24 = vld [vmem:[%s3074_s25 + $0x1100] sm:$0xff] }
  0xa5   : > { %1267 = vst [vmem:[%s3079_s26 + $0x8b0] sm:$0xff] %v1266_v22  ;;  %v1272_v25 = vld [vmem:[%s3074_s25 + $0x1108] sm:$0xff]  ;;  %1269 = vst [vmem:[%s3079_s26 + $0x8b8] sm:$0xff] %v1268_v23  ;;  %v1274_v26 = vld [vmem:[%s3074_s25 + $0x1110] sm:$0xff] }
  0xa6   : > { %1271 = vst [vmem:[%s3079_s26 + $0x8c0] sm:$0xff] %v1270_v24  ;;  %1273 = vst [vmem:[%s3079_s26 + $0x8c8] sm:$0xff] %v1272_v25  ;;  %v1276_v27 = vld [vmem:[%s3074_s25 + $0x1118] sm:$0xff]  ;;  %v1278_v28 = vld [vmem:[%s3074_s25 + $0x1120] sm:$0xff] }
  0xa7   : > { %1275 = vst [vmem:[%s3079_s26 + $0x8d0] sm:$0xff] %v1274_v26  ;;  %1277 = vst [vmem:[%s3079_s26 + $0x8d8] sm:$0xff] %v1276_v27  ;;  %v1280_v29 = vld [vmem:[%s3074_s25 + $0x1128] sm:$0xff]  ;;  %v1282_v30 = vld [vmem:[%s3074_s25 + $0x1130] sm:$0xff] }
  0xa8   : > { %1279 = vst [vmem:[%s3079_s26 + $0x8e0] sm:$0xff] %v1278_v28  ;;  %v1284_v31 = vld [vmem:[%s3074_s25 + $0x1138] sm:$0xff]  ;;  %1281 = vst [vmem:[%s3079_s26 + $0x8e8] sm:$0xff] %v1280_v29 }
  0xa9   : > { %1283 = vst [vmem:[%s3079_s26 + $0x8f0] sm:$0xff] %v1282_v30  ;;  %1285 = vst [vmem:[%s3079_s26 + $0x8f8] sm:$0xff] %v1284_v31 }
  0xaa PF: > { %p2586_p11 = scmp.ge.s32.totalorder %s2996_s11, 1  ;;  %p1290_p12 = scmp.lt.s32.totalorder %s2996_s11, 3 }
  0xac   : > { %p1291_p13 = pnand %p2586_p11, %p1290_p12 }
  0xad   : > { %s3657_s27 = sand.u32 (!%p1291_p13), 1, %s2980_s7   ;;  %s2998_s30 = smov (!%p1291_p13), 64   ;;  %vm1463_vm0 = vcmask (!%p1291_p13), 523264  }
  0xae   : > { %1294 = sbr.rel (%p1291_p13) target bundleno = 594 (0x252), region = 58  ;;  %s2999_s20 = smov (!%p1291_p13), [#allocation3]  }
  0xaf   : > { %s2856_s28 = smul.u32 (!%p1291_p13), 2304, %s3657_s27  ;;  %s2922_s21 = sshll.u32 (!%p1291_p13), %s2999_s20, 4  ;;  %s2923_s21 = int_to_ptr.vmem [resolvable:$false] %s2922_s21 }
  0xb0   : > { %s2857_s2 = smul.u32 (!%p1291_p13), 1152, %s3657_s27  ;;  %s2924_s22 = scalar_lea.vmem (!%p1291_p13), %s2923_s21, 36864 }
  0xb1   : > { %s3660_s29 = scalar_lea.vmem (!%p1291_p13), [#allocation2], %s2856_s28  ;;  %s2865_s4 = smul.u32 (!%p1291_p13), 18432, %s2988_s9 }
  0xb2   : > { %v2589_v32 = vld [vmem:[%s3660_s29 + $0xd0] sm:$0xff] (!%p1291_p13)  ;;  %v2587_v33 = vld [vmem:[%s3660_s29 + $0xc0] sm:$0xff] (!%p1291_p13)  ;;  %v2590_v34 = vld [vmem:[%s3660_s29 + $0xd8] sm:$0xff] (!%p1291_p13)  ;;  %s3785_s3 = scalar_lea.vmem (!%p1291_p13), [#allocation3], %s2857_s2  ;;  %s2483_s9 = scalar_lea.sflag (!%p1291_p13), [#allocation4], %s3657_s27 }
  0xb3   : > { %1395 = vrot.lane.b32.xlu1 (!%p1291_p13), %v2589_v32, %s2998_s30  ;;  %1391 = vrot.lane.b32.xlu0 (!%p1291_p13), %v2587_v33, %s2998_s30  ;;  %v2588_v35 = vld [vmem:[%s3660_s29 + $0xc8] sm:$0xff] (!%p1291_p13)  ;;  %v2591_v37 = vld [vmem:[%s3660_s29 + $0xe0] sm:$0xff] (!%p1291_p13)  ;;  %s2499_s5 = sshll.u32 (!%p1291_p13), %s3785_s3, 4  ;;  %s4386_s15 = scalar_lea.hbm (!%p1291_p13), %s4442_s1, %s2865_s4  ;;  %s4388_s5 = int_to_ptr.vmem [resolvable:$true] %s2499_s5 }
  0xb4   : > { %v2592_v36 = vld [vmem:[%s3660_s29 + $0xe8] sm:$0xff] (!%p1291_p13)  ;;  %v2594_v38 = vld [vmem:[%s3660_s29 + $0xf8] sm:$0xff] (!%p1291_p13)  ;;  %v2593_v39 = vld [vmem:[%s3660_s29 + $0xf0] sm:$0xff] (!%p1291_p13)  ;;  %s2918_s17 = scalar_lea.vmem (!%p1291_p13), %s4388_s5, 18432  ;;  %p2925_p3 = scmp.lt.s32.totalorder (!%p1291_p13), %s4388_s5, %s2923_s21 }
  0xb5   : > { %v2596_v40 = vld [vmem:[%s3660_s29 + $0x108] sm:$0xff]  ;;  %v2595_v41 = vld [vmem:[%s3660_s29 + $0x100] sm:$0xff]  ;;  %v2598_v42 = vld [vmem:[%s3660_s29 + $0x118] sm:$0xff]  ;;  %p2919_p0 = scmp.ne.s32.totalorder %s4388_s5, %s2918_s17  ;;  %p2926_p4 = scmp.lt.s32.totalorder %s2924_s22, %s2918_s17 }
  0xb6   : > { %v2597_v43 = vld [vmem:[%s3660_s29 + $0x110] sm:$0xff]  ;;  %v2600_v44 = vld [vmem:[%s3660_s29 + $0x128] sm:$0xff]  ;;  %v2599_v45 = vld [vmem:[%s3660_s29 + $0x120] sm:$0xff] }
  0xb7   : > { %1397 = vrot.lane.b32.xlu1 %v2590_v34, %s2998_s30  ;;  %1393 = vrot.lane.b32.xlu0 %v2588_v35, %s2998_s30  ;;  %v2602_v46 = vld [vmem:[%s3660_s29 + $0x138] sm:$0xff]  ;;  %v2601_v47 = vld [vmem:[%s3660_s29 + $0x130] sm:$0xff]  ;;  %p2920_p1 = pnand %p2919_p0, %p3051_p5  ;;  %p2927_p6 = por %p2926_p4, %p2925_p3 }
  0xb8   : > { %v2604_v48 = vld [vmem:[%s3660_s29 + $0x148] sm:$0xff]  ;;  %v2603_v49 = vld [vmem:[%s3660_s29 + $0x140] sm:$0xff]  ;;  %v2606_v50 = vld [vmem:[%s3660_s29 + $0x158] sm:$0xff] }
  0xb9   : > { %v2605_v51 = vld [vmem:[%s3660_s29 + $0x150] sm:$0xff]  ;;  %v2608_v52 = vld [vmem:[%s3660_s29 + $0x168] sm:$0xff]  ;;  %v2607_v53 = vld [vmem:[%s3660_s29 + $0x160] sm:$0xff]  ;;  %p2921_p2 = pneg %p2920_p1 }
  0xba   : > { %v2610_v54 = vld [vmem:[%s3660_s29 + $0x178] sm:$0xff]  ;;  %v2609_v55 = vld [vmem:[%s3660_s29 + $0x170] sm:$0xff]  ;;  %v2636_v56 = vld [vmem:[%s3660_s29 + $0x248] sm:$0xff] }
  0xbb   : > { %1401 = vrot.lane.b32.xlu1 %v2592_v36, %s2998_s30  ;;  %1399 = vrot.lane.b32.xlu0 %v2591_v37, %s2998_s30  ;;  %v2635_v57 = vld [vmem:[%s3660_s29 + $0x240] sm:$0xff]  ;;  %v2638_v58 = vld [vmem:[%s3660_s29 + $0x258] sm:$0xff]  ;;  %p2928_p7 = pnand %p2927_p6, %p2921_p2 }
  0xbc   : > { %v2637_v59 = vld [vmem:[%s3660_s29 + $0x250] sm:$0xff]  ;;  %v2640_v60 = vld [vmem:[%s3660_s29 + $0x268] sm:$0xff]  ;;  %v2639_v61 = vld [vmem:[%s3660_s29 + $0x260] sm:$0xff] }
  0xbd   : > { %v2642_v62 = vld [vmem:[%s3660_s29 + $0x278] sm:$0xff]  ;;  %v2641_v63 = vld [vmem:[%s3660_s29 + $0x270] sm:$0xff]  ;;  %v2644_v0 = vld [vmem:[%s3660_s29 + $0x288] sm:$0xff] }
  0xbe   : > { %v2643_v1 = vld [vmem:[%s3660_s29 + $0x280] sm:$0xff]  ;;  %v2646_v2 = vld [vmem:[%s3660_s29 + $0x298] sm:$0xff]  ;;  %v2645_v3 = vld [vmem:[%s3660_s29 + $0x290] sm:$0xff] }
  0xbf   : > { %1405 = vrot.lane.b32.xlu1 %v2594_v38, %s2998_s30  ;;  %1403 = vrot.lane.b32.xlu0 %v2593_v39, %s2998_s30  ;;  %v2648_v4 = vld [vmem:[%s3660_s29 + $0x2a8] sm:$0xff]  ;;  %v2647_v5 = vld [vmem:[%s3660_s29 + $0x2a0] sm:$0xff] }
  0xc0   : > { %v2650_v6 = vld [vmem:[%s3660_s29 + $0x2b8] sm:$0xff]  ;;  %v2649_v7 = vld [vmem:[%s3660_s29 + $0x2b0] sm:$0xff]  ;;  %v2652_v8 = vld [vmem:[%s3660_s29 + $0x2c8] sm:$0xff] }
  0xc1   : > { %v2651_v9 = vld [vmem:[%s3660_s29 + $0x2c0] sm:$0xff]  ;;  %v2654_v10 = vld [vmem:[%s3660_s29 + $0x2d8] sm:$0xff]  ;;  %v2653_v11 = vld [vmem:[%s3660_s29 + $0x2d0] sm:$0xff] }
  0xc2   : > { %v2656_v12 = vld [vmem:[%s3660_s29 + $0x2e8] sm:$0xff]  ;;  %v2655_v13 = vld [vmem:[%s3660_s29 + $0x2e0] sm:$0xff]  ;;  %v2658_v14 = vld [vmem:[%s3660_s29 + $0x2f8] sm:$0xff] }
  0xc3   : > { %1409 = vrot.lane.b32.xlu1 %v2596_v40, %s2998_s30  ;;  %1407 = vrot.lane.b32.xlu0 %v2595_v41, %s2998_s30  ;;  %v2657_v15 = vld [vmem:[%s3660_s29 + $0x2f0] sm:$0xff]  ;;  %v2684_v16 = vld [vmem:[%s3660_s29 + $0x3c8] sm:$0xff] }
  0xc4   : > { %v2683_v17 = vld [vmem:[%s3660_s29 + $0x3c0] sm:$0xff]  ;;  %v2686_v18 = vld [vmem:[%s3660_s29 + $0x3d8] sm:$0xff]  ;;  %v2685_v19 = vld [vmem:[%s3660_s29 + $0x3d0] sm:$0xff] }
  0xc5   : > { %v2688_v20 = vld [vmem:[%s3660_s29 + $0x3e8] sm:$0xff]  ;;  %v2687_v21 = vld [vmem:[%s3660_s29 + $0x3e0] sm:$0xff]  ;;  %v2690_v22 = vld [vmem:[%s3660_s29 + $0x3f8] sm:$0xff] }
  0xc6   : > { %v2689_v23 = vld [vmem:[%s3660_s29 + $0x3f0] sm:$0xff]  ;;  %v2692_v24 = vld [vmem:[%s3660_s29 + $0x408] sm:$0xff]  ;;  %v2691_v25 = vld [vmem:[%s3660_s29 + $0x400] sm:$0xff] }
  0xc7   : > { %1413 = vrot.lane.b32.xlu1 %v2598_v42, %s2998_s30  ;;  %1411 = vrot.lane.b32.xlu0 %v2597_v43, %s2998_s30  ;;  %v1320_v26 = vld [vmem:[%s3660_s29 + $0x10] sm:$0xff]  ;;  %v1318_v27 = vld [vmem:[%s3660_s29] sm:$0xff] }
  0xc8   : > { %v2694_v28 = vld [vmem:[%s3660_s29 + $0x418] sm:$0xff]  ;;  %v2693_v29 = vld [vmem:[%s3660_s29 + $0x410] sm:$0xff]  ;;  %v1319_v35 = vld [vmem:[%s3660_s29 + $0x8] sm:$0xff] }
  0xc9   : > { %v1321_v34 = vld [vmem:[%s3660_s29 + $0x18] sm:$0xff]  ;;  %v2696_v36 = vld [vmem:[%s3660_s29 + $0x428] sm:$0xff]  ;;  %v2695_v37 = vld [vmem:[%s3660_s29 + $0x420] sm:$0xff] }
  0xca   : > { %v1323_v42 = vld [vmem:[%s3660_s29 + $0x28] sm:$0xff]  ;;  %v1322_v43 = vld [vmem:[%s3660_s29 + $0x20] sm:$0xff] }
  0xcb   : > { %1417 = vrot.lane.b32.xlu1 %v2600_v44, %s2998_s30  ;;  %1415 = vrot.lane.b32.xlu0 %v2599_v45, %s2998_s30  ;;  %v2698_v44 = vld [vmem:[%s3660_s29 + $0x438] sm:$0xff]  ;;  %v2697_v45 = vld [vmem:[%s3660_s29 + $0x430] sm:$0xff] }
  0xcf   : > { %1421 = vrot.lane.b32.xlu1 %v2602_v46, %s2998_s30  ;;  %1419 = vrot.lane.b32.xlu0 %v2601_v47, %s2998_s30 }
  0xd3   : > { %1425 = vrot.lane.b32.xlu1 %v2604_v48, %s2998_s30  ;;  %1423 = vrot.lane.b32.xlu0 %v2603_v49, %s2998_s30 }
  0xd7   : > { %1429 = vrot.lane.b32.xlu1 %v2606_v50, %s2998_s30  ;;  %1427 = vrot.lane.b32.xlu0 %v2605_v51, %s2998_s30  ;;  %v1325_v50 = vld [vmem:[%s3660_s29 + $0x38] sm:$0xff]  ;;  %v1324_v51 = vld [vmem:[%s3660_s29 + $0x30] sm:$0xff] }
  0xdb   : > { %1433 = vrot.lane.b32.xlu1 %v2608_v52, %s2998_s30  ;;  %1431 = vrot.lane.b32.xlu0 %v2607_v53, %s2998_s30  ;;  %v2700_v52 = vld [vmem:[%s3660_s29 + $0x448] sm:$0xff]  ;;  %v2699_v53 = vld [vmem:[%s3660_s29 + $0x440] sm:$0xff] }
  0xdf   : > { %1437 = vrot.lane.b32.xlu1 %v2610_v54, %s2998_s30  ;;  %1435 = vrot.lane.b32.xlu0 %v2609_v55, %s2998_s30 }
  0xe3   : > { %1588 = vrot.lane.b32.xlu1 %v2636_v56, %s2998_s30  ;;  %1586 = vrot.lane.b32.xlu0 %v2635_v57, %s2998_s30 }
  0xe7   : > { %1592 = vrot.lane.b32.xlu1 %v2638_v58, %s2998_s30  ;;  %1590 = vrot.lane.b32.xlu0 %v2637_v59, %s2998_s30  ;;  %v1327_v58 = vld [vmem:[%s3660_s29 + $0x48] sm:$0xff]  ;;  %v1326_v59 = vld [vmem:[%s3660_s29 + $0x40] sm:$0xff] }
  0xeb   : > { %1596 = vrot.lane.b32.xlu1 %v2640_v60, %s2998_s30  ;;  %1594 = vrot.lane.b32.xlu0 %v2639_v61, %s2998_s30  ;;  %v2702_v60 = vld [vmem:[%s3660_s29 + $0x458] sm:$0xff]  ;;  %v2701_v61 = vld [vmem:[%s3660_s29 + $0x450] sm:$0xff] }
  0xef   : > { %1600 = vrot.lane.b32.xlu1 %v2642_v62, %s2998_s30  ;;  %1598 = vrot.lane.b32.xlu0 %v2641_v63, %s2998_s30 }
  0xf3   : > { %1604 = vrot.lane.b32.xlu1 %v2644_v0, %s2998_s30  ;;  %1602 = vrot.lane.b32.xlu0 %v2643_v1, %s2998_s30 }
  0xf7   : > { %1608 = vrot.lane.b32.xlu1 %v2646_v2, %s2998_s30  ;;  %1606 = vrot.lane.b32.xlu0 %v2645_v3, %s2998_s30  ;;  %v1329_v2 = vld [vmem:[%s3660_s29 + $0x58] sm:$0xff]  ;;  %v1328_v3 = vld [vmem:[%s3660_s29 + $0x50] sm:$0xff] }
  0xfb   : > { %1612 = vrot.lane.b32.xlu1 %v2648_v4, %s2998_s30  ;;  %1610 = vrot.lane.b32.xlu0 %v2647_v5, %s2998_s30  ;;  %v2704_v4 = vld [vmem:[%s3660_s29 + $0x468] sm:$0xff]  ;;  %v2703_v5 = vld [vmem:[%s3660_s29 + $0x460] sm:$0xff] }
  0xff   : > { %1616 = vrot.lane.b32.xlu1 %v2650_v6, %s2998_s30  ;;  %1614 = vrot.lane.b32.xlu0 %v2649_v7, %s2998_s30 }
 0x103   : > { %1620 = vrot.lane.b32.xlu1 %v2652_v8, %s2998_s30  ;;  %1618 = vrot.lane.b32.xlu0 %v2651_v9, %s2998_s30 }
 0x107   : > { %1624 = vrot.lane.b32.xlu1 %v2654_v10, %s2998_s30  ;;  %1622 = vrot.lane.b32.xlu0 %v2653_v11, %s2998_s30  ;;  %v1331_v10 = vld [vmem:[%s3660_s29 + $0x68] sm:$0xff]  ;;  %v1330_v11 = vld [vmem:[%s3660_s29 + $0x60] sm:$0xff] }
 0x10b   : > { %1628 = vrot.lane.b32.xlu1 %v2656_v12, %s2998_s30  ;;  %1626 = vrot.lane.b32.xlu0 %v2655_v13, %s2998_s30  ;;  %v2706_v12 = vld [vmem:[%s3660_s29 + $0x478] sm:$0xff]  ;;  %v2705_v13 = vld [vmem:[%s3660_s29 + $0x470] sm:$0xff] }
 0x10f   : > { %1632 = vrot.lane.b32.xlu1 %v2658_v14, %s2998_s30  ;;  %1630 = vrot.lane.b32.xlu0 %v2657_v15, %s2998_s30 }
 0x113   : > { %1782 = vrot.lane.b32.xlu1 %v2684_v16, %s2998_s30  ;;  %1780 = vrot.lane.b32.xlu0 %v2683_v17, %s2998_s30 }
 0x117   : > { %1786 = vrot.lane.b32.xlu1 %v2686_v18, %s2998_s30  ;;  %1784 = vrot.lane.b32.xlu0 %v2685_v19, %s2998_s30  ;;  %v1333_v18 = vld [vmem:[%s3660_s29 + $0x78] sm:$0xff]  ;;  %v1332_v19 = vld [vmem:[%s3660_s29 + $0x70] sm:$0xff] }
 0x11b   : > { %1790 = vrot.lane.b32.xlu1 %v2688_v20, %s2998_s30  ;;  %1788 = vrot.lane.b32.xlu0 %v2687_v21, %s2998_s30  ;;  %v2732_v20 = vld [vmem:[%s3660_s29 + $0x548] sm:$0xff]  ;;  %v2731_v21 = vld [vmem:[%s3660_s29 + $0x540] sm:$0xff] }
 0x11f   : > { %1794 = vrot.lane.b32.xlu1 %v2690_v22, %s2998_s30  ;;  %1792 = vrot.lane.b32.xlu0 %v2689_v23, %s2998_s30 }
 0x123   : > { %1798 = vrot.lane.b32.xlu1 %v2692_v24, %s2998_s30  ;;  %1796 = vrot.lane.b32.xlu0 %v2691_v25, %s2998_s30 }
 0x125   : > { %v1396_v30 = vpop.permute.xlu1 %1395  ;;  %v1392_v31 = vpop.permute.xlu0 %1391 }
 0x126   : > { %v1466_v32 = vsel %vm1463_vm0, %v1320_v26, %v1396_v30  ;;  %v1464_v33 = vsel %vm1463_vm0, %v1318_v27, %v1392_v31  ;;  %v1335_v26 = vld [vmem:[%s3660_s29 + $0x88] sm:$0xff]  ;;  %v1334_v27 = vld [vmem:[%s3660_s29 + $0x80] sm:$0xff] }
 0x127   : > { %1490 = vst [vmem:[%s3785_s3 + $0x60] sm:$0xff] %v1466_v32  ;;  %1488 = vst [vmem:[%s3785_s3] sm:$0xff] %v1464_v33  ;;  %1802 = vrot.lane.b32.xlu1 %v2694_v28, %s2998_s30  ;;  %1800 = vrot.lane.b32.xlu0 %v2693_v29, %s2998_s30 }
 0x128   : > { %v2734_v28 = vld [vmem:[%s3660_s29 + $0x558] sm:$0xff]  ;;  %v2733_v29 = vld [vmem:[%s3660_s29 + $0x550] sm:$0xff] }
 0x129   : > { %v1398_v38 = vpop.permute.xlu1 %1397  ;;  %v1394_v39 = vpop.permute.xlu0 %1393 }
 0x12a   : > { %v1467_v40 = vsel %vm1463_vm0, %v1321_v34, %v1398_v38  ;;  %v1465_v41 = vsel %vm1463_vm0, %v1319_v35, %v1394_v39  ;;  %v1337_v34 = vld [vmem:[%s3660_s29 + $0x98] sm:$0xff]  ;;  %v1336_v35 = vld [vmem:[%s3660_s29 + $0x90] sm:$0xff] }
 0x12b   : > { %1491 = vst [vmem:[%s3785_s3 + $0x90] sm:$0xff] %v1467_v40  ;;  %1489 = vst [vmem:[%s3785_s3 + $0x30] sm:$0xff] %v1465_v41  ;;  %1806 = vrot.lane.b32.xlu1 %v2696_v36, %s2998_s30  ;;  %1804 = vrot.lane.b32.xlu0 %v2695_v37, %s2998_s30 }
 0x12c   : > { %v2736_v36 = vld [vmem:[%s3660_s29 + $0x568] sm:$0xff]  ;;  %v2735_v37 = vld [vmem:[%s3660_s29 + $0x560] sm:$0xff] }
 0x12d   : > { %v1402_v46 = vpop.permute.xlu1 %1401  ;;  %v1400_v47 = vpop.permute.xlu0 %1399 }
 0x12e   : > { %v1469_v48 = vsel %vm1463_vm0, %v1323_v42, %v1402_v46  ;;  %v1468_v49 = vsel %vm1463_vm0, %v1322_v43, %v1400_v47  ;;  %v1339_v42 = vld [vmem:[%s3660_s29 + $0xa8] sm:$0xff]  ;;  %v1338_v43 = vld [vmem:[%s3660_s29 + $0xa0] sm:$0xff] }
 0x12f   : > { %1493 = vst [vmem:[%s3785_s3 + $0xf0] sm:$0xff] %v1469_v48  ;;  %1492 = vst [vmem:[%s3785_s3 + $0xc0] sm:$0xff] %v1468_v49  ;;  %1810 = vrot.lane.b32.xlu1 %v2698_v44, %s2998_s30  ;;  %1808 = vrot.lane.b32.xlu0 %v2697_v45, %s2998_s30 }
 0x130   : > { %v2738_v44 = vld [vmem:[%s3660_s29 + $0x578] sm:$0xff]  ;;  %v2737_v45 = vld [vmem:[%s3660_s29 + $0x570] sm:$0xff] }
 0x131   : > { %v1406_v54 = vpop.permute.xlu1 %1405  ;;  %v1404_v55 = vpop.permute.xlu0 %1403 }
 0x132   : > { %v1471_v56 = vsel %vm1463_vm0, %v1325_v50, %v1406_v54  ;;  %v1470_v57 = vsel %vm1463_vm0, %v1324_v51, %v1404_v55  ;;  %v1341_v50 = vld [vmem:[%s3660_s29 + $0xb8] sm:$0xff]  ;;  %v1340_v51 = vld [vmem:[%s3660_s29 + $0xb0] sm:$0xff] }
 0x133   : > { %1495 = vst [vmem:[%s3785_s3 + $0x150] sm:$0xff] %v1471_v56  ;;  %1494 = vst [vmem:[%s3785_s3 + $0x120] sm:$0xff] %v1470_v57  ;;  %1814 = vrot.lane.b32.xlu1 %v2700_v52, %s2998_s30  ;;  %1812 = vrot.lane.b32.xlu0 %v2699_v53, %s2998_s30 }
 0x134   : > { %v2740_v52 = vld [vmem:[%s3660_s29 + $0x588] sm:$0xff]  ;;  %v2739_v53 = vld [vmem:[%s3660_s29 + $0x580] sm:$0xff] }
 0x135   : > { %v1410_v62 = vpop.permute.xlu1 %1409  ;;  %v1408_v63 = vpop.permute.xlu0 %1407 }
 0x136   : > { %v1473_v0 = vsel %vm1463_vm0, %v1327_v58, %v1410_v62  ;;  %v1472_v1 = vsel %vm1463_vm0, %v1326_v59, %v1408_v63  ;;  %v2612_v58 = vld [vmem:[%s3660_s29 + $0x188] sm:$0xff]  ;;  %v2611_v59 = vld [vmem:[%s3660_s29 + $0x180] sm:$0xff] }
 0x137   : > { %1497 = vst [vmem:[%s3785_s3 + $0x1b0] sm:$0xff] %v1473_v0  ;;  %1496 = vst [vmem:[%s3785_s3 + $0x180] sm:$0xff] %v1472_v1  ;;  %1818 = vrot.lane.b32.xlu1 %v2702_v60, %s2998_s30  ;;  %1816 = vrot.lane.b32.xlu0 %v2701_v61, %s2998_s30 }
 0x138   : > { %v2742_v60 = vld [vmem:[%s3660_s29 + $0x598] sm:$0xff]  ;;  %v2741_v61 = vld [vmem:[%s3660_s29 + $0x590] sm:$0xff] }
 0x139   : > { %v1414_v6 = vpop.permute.xlu1 %1413  ;;  %v1412_v7 = vpop.permute.xlu0 %1411 }
 0x13a   : > { %v1475_v8 = vsel %vm1463_vm0, %v1329_v2, %v1414_v6  ;;  %v1474_v9 = vsel %vm1463_vm0, %v1328_v3, %v1412_v7  ;;  %v2614_v2 = vld [vmem:[%s3660_s29 + $0x198] sm:$0xff]  ;;  %v2613_v3 = vld [vmem:[%s3660_s29 + $0x190] sm:$0xff] }
 0x13b   : > { %1499 = vst [vmem:[%s3785_s3 + $0x210] sm:$0xff] %v1475_v8  ;;  %1498 = vst [vmem:[%s3785_s3 + $0x1e0] sm:$0xff] %v1474_v9  ;;  %1822 = vrot.lane.b32.xlu1 %v2704_v4, %s2998_s30  ;;  %1820 = vrot.lane.b32.xlu0 %v2703_v5, %s2998_s30 }
 0x13c   : > { %v2744_v4 = vld [vmem:[%s3660_s29 + $0x5a8] sm:$0xff]  ;;  %v2743_v5 = vld [vmem:[%s3660_s29 + $0x5a0] sm:$0xff] }
 0x13d   : > { %v1418_v14 = vpop.permute.xlu1 %1417  ;;  %v1416_v15 = vpop.permute.xlu0 %1415 }
 0x13e   : > { %v1477_v16 = vsel %vm1463_vm0, %v1331_v10, %v1418_v14  ;;  %v1476_v17 = vsel %vm1463_vm0, %v1330_v11, %v1416_v15  ;;  %v2616_v10 = vld [vmem:[%s3660_s29 + $0x1a8] sm:$0xff]  ;;  %v2615_v11 = vld [vmem:[%s3660_s29 + $0x1a0] sm:$0xff] }
 0x13f   : > { %1501 = vst [vmem:[%s3785_s3 + $0x270] sm:$0xff] %v1477_v16  ;;  %1500 = vst [vmem:[%s3785_s3 + $0x240] sm:$0xff] %v1476_v17  ;;  %1826 = vrot.lane.b32.xlu1 %v2706_v12, %s2998_s30  ;;  %1824 = vrot.lane.b32.xlu0 %v2705_v13, %s2998_s30 }
 0x140   : > { %v2746_v12 = vld [vmem:[%s3660_s29 + $0x5b8] sm:$0xff]  ;;  %v2745_v13 = vld [vmem:[%s3660_s29 + $0x5b0] sm:$0xff] }
 0x141   : > { %v1422_v22 = vpop.permute.xlu1 %1421  ;;  %v1420_v23 = vpop.permute.xlu0 %1419 }
 0x142   : > { %v1479_v24 = vsel %vm1463_vm0, %v1333_v18, %v1422_v22  ;;  %v1478_v25 = vsel %vm1463_vm0, %v1332_v19, %v1420_v23  ;;  %v2618_v18 = vld [vmem:[%s3660_s29 + $0x1b8] sm:$0xff]  ;;  %v2617_v19 = vld [vmem:[%s3660_s29 + $0x1b0] sm:$0xff] }
 0x143   : > { %1503 = vst [vmem:[%s3785_s3 + $0x2d0] sm:$0xff] %v1479_v24  ;;  %1502 = vst [vmem:[%s3785_s3 + $0x2a0] sm:$0xff] %v1478_v25  ;;  %1976 = vrot.lane.b32.xlu1 %v2732_v20, %s2998_s30  ;;  %1974 = vrot.lane.b32.xlu0 %v2731_v21, %s2998_s30 }
 0x144   : > { %v2748_v20 = vld [vmem:[%s3660_s29 + $0x5c8] sm:$0xff]  ;;  %v2747_v21 = vld [vmem:[%s3660_s29 + $0x5c0] sm:$0xff] }
 0x145   : > { %v1426_v30 = vpop.permute.xlu1 %1425  ;;  %v1424_v31 = vpop.permute.xlu0 %1423 }
 0x146   : > { %v1481_v32 = vsel %vm1463_vm0, %v1335_v26, %v1426_v30  ;;  %v1480_v33 = vsel %vm1463_vm0, %v1334_v27, %v1424_v31  ;;  %v2620_v26 = vld [vmem:[%s3660_s29 + $0x1c8] sm:$0xff]  ;;  %v2619_v27 = vld [vmem:[%s3660_s29 + $0x1c0] sm:$0xff] }
 0x147   : > { %1505 = vst [vmem:[%s3785_s3 + $0x330] sm:$0xff] %v1481_v32  ;;  %1504 = vst [vmem:[%s3785_s3 + $0x300] sm:$0xff] %v1480_v33  ;;  %1980 = vrot.lane.b32.xlu1 %v2734_v28, %s2998_s30  ;;  %1978 = vrot.lane.b32.xlu0 %v2733_v29, %s2998_s30 }
 0x148   : > { %v2750_v28 = vld [vmem:[%s3660_s29 + $0x5d8] sm:$0xff]  ;;  %v2749_v29 = vld [vmem:[%s3660_s29 + $0x5d0] sm:$0xff] }
 0x149   : > { %v1430_v38 = vpop.permute.xlu1 %1429  ;;  %v1428_v39 = vpop.permute.xlu0 %1427 }
 0x14a   : > { %v1483_v40 = vsel %vm1463_vm0, %v1337_v34, %v1430_v38  ;;  %v1482_v41 = vsel %vm1463_vm0, %v1336_v35, %v1428_v39  ;;  %v2622_v34 = vld [vmem:[%s3660_s29 + $0x1d8] sm:$0xff]  ;;  %v2621_v35 = vld [vmem:[%s3660_s29 + $0x1d0] sm:$0xff] }
 0x14b   : > { %1507 = vst [vmem:[%s3785_s3 + $0x390] sm:$0xff] %v1483_v40  ;;  %1506 = vst [vmem:[%s3785_s3 + $0x360] sm:$0xff] %v1482_v41  ;;  %1984 = vrot.lane.b32.xlu1 %v2736_v36, %s2998_s30  ;;  %1982 = vrot.lane.b32.xlu0 %v2735_v37, %s2998_s30 }
 0x14c   : > { %v2752_v36 = vld [vmem:[%s3660_s29 + $0x5e8] sm:$0xff]  ;;  %v2751_v37 = vld [vmem:[%s3660_s29 + $0x5e0] sm:$0xff] }
 0x14d   : > { %v1434_v46 = vpop.permute.xlu1 %1433  ;;  %v1432_v47 = vpop.permute.xlu0 %1431 }
 0x14e   : > { %v1485_v48 = vsel %vm1463_vm0, %v1339_v42, %v1434_v46  ;;  %v1484_v49 = vsel %vm1463_vm0, %v1338_v43, %v1432_v47  ;;  %v2624_v42 = vld [vmem:[%s3660_s29 + $0x1e8] sm:$0xff]  ;;  %v2623_v43 = vld [vmem:[%s3660_s29 + $0x1e0] sm:$0xff] }
 0x14f   : > { %1509 = vst [vmem:[%s3785_s3 + $0x3f0] sm:$0xff] %v1485_v48  ;;  %1508 = vst [vmem:[%s3785_s3 + $0x3c0] sm:$0xff] %v1484_v49  ;;  %1988 = vrot.lane.b32.xlu1 %v2738_v44, %s2998_s30  ;;  %1986 = vrot.lane.b32.xlu0 %v2737_v45, %s2998_s30 }
 0x150   : > { %v2754_v44 = vld [vmem:[%s3660_s29 + $0x5f8] sm:$0xff]  ;;  %v2753_v45 = vld [vmem:[%s3660_s29 + $0x5f0] sm:$0xff] }
 0x151   : > { %v1438_v54 = vpop.permute.xlu1 %1437  ;;  %v1436_v55 = vpop.permute.xlu0 %1435 }
 0x152   : > { %v1487_v56 = vsel %vm1463_vm0, %v1341_v50, %v1438_v54  ;;  %v1486_v57 = vsel %vm1463_vm0, %v1340_v51, %v1436_v55  ;;  %v2626_v50 = vld [vmem:[%s3660_s29 + $0x1f8] sm:$0xff]  ;;  %v2625_v51 = vld [vmem:[%s3660_s29 + $0x1f0] sm:$0xff] }
 0x153   : > { %1511 = vst [vmem:[%s3785_s3 + $0x450] sm:$0xff] %v1487_v56  ;;  %1510 = vst [vmem:[%s3785_s3 + $0x420] sm:$0xff] %v1486_v57  ;;  %1992 = vrot.lane.b32.xlu1 %v2740_v52, %s2998_s30  ;;  %1990 = vrot.lane.b32.xlu0 %v2739_v53, %s2998_s30 }
 0x154   : > { %v2780_v52 = vld [vmem:[%s3660_s29 + $0x6c8] sm:$0xff]  ;;  %v2779_v53 = vld [vmem:[%s3660_s29 + $0x6c0] sm:$0xff] }
 0x155   : > { %v1589_v62 = vpop.permute.xlu1 %1588  ;;  %v1587_v63 = vpop.permute.xlu0 %1586 }
 0x156   : > { %v1659_v0 = vsel %vm1463_vm0, %v2612_v58, %v1589_v62  ;;  %v1658_v1 = vsel %vm1463_vm0, %v2611_v59, %v1587_v63  ;;  %v2628_v58 = vld [vmem:[%s3660_s29 + $0x208] sm:$0xff]  ;;  %v2627_v59 = vld [vmem:[%s3660_s29 + $0x200] sm:$0xff] }
 0x157   : > { %1683 = vst [vmem:[%s3785_s3 + $0x38] sm:$0xff] %v1659_v0  ;;  %1682 = vst [vmem:[%s3785_s3 + $0x8] sm:$0xff] %v1658_v1  ;;  %1996 = vrot.lane.b32.xlu1 %v2742_v60, %s2998_s30  ;;  %1994 = vrot.lane.b32.xlu0 %v2741_v61, %s2998_s30 }
 0x158   : > { %v2782_v60 = vld [vmem:[%s3660_s29 + $0x6d8] sm:$0xff]  ;;  %v2781_v61 = vld [vmem:[%s3660_s29 + $0x6d0] sm:$0xff] }
 0x159   : > { %v1593_v6 = vpop.permute.xlu1 %1592  ;;  %v1591_v7 = vpop.permute.xlu0 %1590 }
 0x15a   : > { %v1661_v8 = vsel %vm1463_vm0, %v2614_v2, %v1593_v6  ;;  %v1660_v9 = vsel %vm1463_vm0, %v2613_v3, %v1591_v7  ;;  %v2630_v2 = vld [vmem:[%s3660_s29 + $0x218] sm:$0xff]  ;;  %v2629_v3 = vld [vmem:[%s3660_s29 + $0x210] sm:$0xff] }
 0x15b   : > { %1685 = vst [vmem:[%s3785_s3 + $0x98] sm:$0xff] %v1661_v8  ;;  %1684 = vst [vmem:[%s3785_s3 + $0x68] sm:$0xff] %v1660_v9  ;;  %2000 = vrot.lane.b32.xlu1 %v2744_v4, %s2998_s30  ;;  %1998 = vrot.lane.b32.xlu0 %v2743_v5, %s2998_s30 }
 0x15c   : > { %v2784_v4 = vld [vmem:[%s3660_s29 + $0x6e8] sm:$0xff]  ;;  %v2783_v5 = vld [vmem:[%s3660_s29 + $0x6e0] sm:$0xff] }
 0x15d   : > { %v1597_v14 = vpop.permute.xlu1 %1596  ;;  %v1595_v15 = vpop.permute.xlu0 %1594 }
 0x15e   : > { %v1663_v16 = vsel %vm1463_vm0, %v2616_v10, %v1597_v14  ;;  %v1662_v17 = vsel %vm1463_vm0, %v2615_v11, %v1595_v15  ;;  %v2632_v10 = vld [vmem:[%s3660_s29 + $0x228] sm:$0xff]  ;;  %v2631_v11 = vld [vmem:[%s3660_s29 + $0x220] sm:$0xff] }
 0x15f   : > { %1687 = vst [vmem:[%s3785_s3 + $0xf8] sm:$0xff] %v1663_v16  ;;  %1686 = vst [vmem:[%s3785_s3 + $0xc8] sm:$0xff] %v1662_v17  ;;  %2004 = vrot.lane.b32.xlu1 %v2746_v12, %s2998_s30  ;;  %2002 = vrot.lane.b32.xlu0 %v2745_v13, %s2998_s30 }
 0x160   : > { %v2786_v12 = vld [vmem:[%s3660_s29 + $0x6f8] sm:$0xff]  ;;  %v2785_v13 = vld [vmem:[%s3660_s29 + $0x6f0] sm:$0xff] }
 0x161   : > { %v1601_v22 = vpop.permute.xlu1 %1600  ;;  %v1599_v23 = vpop.permute.xlu0 %1598 }
 0x162   : > { %v1665_v24 = vsel %vm1463_vm0, %v2618_v18, %v1601_v22  ;;  %v1664_v25 = vsel %vm1463_vm0, %v2617_v19, %v1599_v23  ;;  %v2634_v18 = vld [vmem:[%s3660_s29 + $0x238] sm:$0xff]  ;;  %v2633_v19 = vld [vmem:[%s3660_s29 + $0x230] sm:$0xff] }
 0x163   : > { %1689 = vst [vmem:[%s3785_s3 + $0x158] sm:$0xff] %v1665_v24  ;;  %1688 = vst [vmem:[%s3785_s3 + $0x128] sm:$0xff] %v1664_v25  ;;  %2008 = vrot.lane.b32.xlu1 %v2748_v20, %s2998_s30  ;;  %2006 = vrot.lane.b32.xlu0 %v2747_v21, %s2998_s30 }
 0x164   : > { %v2788_v20 = vld [vmem:[%s3660_s29 + $0x708] sm:$0xff]  ;;  %v2787_v21 = vld [vmem:[%s3660_s29 + $0x700] sm:$0xff] }
 0x165   : > { %v1605_v30 = vpop.permute.xlu1 %1604  ;;  %v1603_v31 = vpop.permute.xlu0 %1602 }
 0x166   : > { %v1667_v32 = vsel %vm1463_vm0, %v2620_v26, %v1605_v30  ;;  %v1666_v33 = vsel %vm1463_vm0, %v2619_v27, %v1603_v31  ;;  %v2660_v26 = vld [vmem:[%s3660_s29 + $0x308] sm:$0xff]  ;;  %v2659_v27 = vld [vmem:[%s3660_s29 + $0x300] sm:$0xff] }
 0x167   : > { %1691 = vst [vmem:[%s3785_s3 + $0x1b8] sm:$0xff] %v1667_v32  ;;  %1690 = vst [vmem:[%s3785_s3 + $0x188] sm:$0xff] %v1666_v33  ;;  %2012 = vrot.lane.b32.xlu1 %v2750_v28, %s2998_s30  ;;  %2010 = vrot.lane.b32.xlu0 %v2749_v29, %s2998_s30 }
 0x168   : > { %v2790_v28 = vld [vmem:[%s3660_s29 + $0x718] sm:$0xff]  ;;  %v2789_v29 = vld [vmem:[%s3660_s29 + $0x710] sm:$0xff] }
 0x169   : > { %v1609_v38 = vpop.permute.xlu1 %1608  ;;  %v1607_v39 = vpop.permute.xlu0 %1606 }
 0x16a   : > { %v1669_v40 = vsel %vm1463_vm0, %v2622_v34, %v1609_v38  ;;  %v1668_v41 = vsel %vm1463_vm0, %v2621_v35, %v1607_v39  ;;  %v2662_v34 = vld [vmem:[%s3660_s29 + $0x318] sm:$0xff]  ;;  %v2661_v35 = vld [vmem:[%s3660_s29 + $0x310] sm:$0xff] }
 0x16b   : > { %1693 = vst [vmem:[%s3785_s3 + $0x218] sm:$0xff] %v1669_v40  ;;  %1692 = vst [vmem:[%s3785_s3 + $0x1e8] sm:$0xff] %v1668_v41  ;;  %2016 = vrot.lane.b32.xlu1 %v2752_v36, %s2998_s30  ;;  %2014 = vrot.lane.b32.xlu0 %v2751_v37, %s2998_s30 }
 0x16c   : > { %v2792_v36 = vld [vmem:[%s3660_s29 + $0x728] sm:$0xff]  ;;  %v2791_v37 = vld [vmem:[%s3660_s29 + $0x720] sm:$0xff] }
 0x16d   : > { %v1613_v46 = vpop.permute.xlu1 %1612  ;;  %v1611_v47 = vpop.permute.xlu0 %1610 }
 0x16e   : > { %v1671_v48 = vsel %vm1463_vm0, %v2624_v42, %v1613_v46  ;;  %v1670_v49 = vsel %vm1463_vm0, %v2623_v43, %v1611_v47  ;;  %v2664_v42 = vld [vmem:[%s3660_s29 + $0x328] sm:$0xff]  ;;  %v2663_v43 = vld [vmem:[%s3660_s29 + $0x320] sm:$0xff] }
 0x16f   : > { %1695 = vst [vmem:[%s3785_s3 + $0x278] sm:$0xff] %v1671_v48  ;;  %1694 = vst [vmem:[%s3785_s3 + $0x248] sm:$0xff] %v1670_v49  ;;  %2020 = vrot.lane.b32.xlu1 %v2754_v44, %s2998_s30  ;;  %2018 = vrot.lane.b32.xlu0 %v2753_v45, %s2998_s30 }
 0x170   : > { %v2794_v44 = vld [vmem:[%s3660_s29 + $0x738] sm:$0xff]  ;;  %v2793_v45 = vld [vmem:[%s3660_s29 + $0x730] sm:$0xff] }
 0x171   : > { %v1617_v54 = vpop.permute.xlu1 %1616  ;;  %v1615_v55 = vpop.permute.xlu0 %1614 }
 0x172   : > { %v1673_v56 = vsel %vm1463_vm0, %v2626_v50, %v1617_v54  ;;  %v1672_v57 = vsel %vm1463_vm0, %v2625_v51, %v1615_v55  ;;  %v2666_v50 = vld [vmem:[%s3660_s29 + $0x338] sm:$0xff]  ;;  %v2665_v51 = vld [vmem:[%s3660_s29 + $0x330] sm:$0xff] }
 0x173   : > { %1697 = vst [vmem:[%s3785_s3 + $0x2d8] sm:$0xff] %v1673_v56  ;;  %1696 = vst [vmem:[%s3785_s3 + $0x2a8] sm:$0xff] %v1672_v57  ;;  %2170 = vrot.lane.b32.xlu1 %v2780_v52, %s2998_s30  ;;  %2168 = vrot.lane.b32.xlu0 %v2779_v53, %s2998_s30 }
 0x174   : > { %v2796_v52 = vld [vmem:[%s3660_s29 + $0x748] sm:$0xff]  ;;  %v2795_v53 = vld [vmem:[%s3660_s29 + $0x740] sm:$0xff] }
 0x175   : > { %v1621_v62 = vpop.permute.xlu1 %1620  ;;  %v1619_v63 = vpop.permute.xlu0 %1618 }
 0x176   : > { %v1675_v0 = vsel %vm1463_vm0, %v2628_v58, %v1621_v62  ;;  %v1674_v1 = vsel %vm1463_vm0, %v2627_v59, %v1619_v63  ;;  %v2668_v58 = vld [vmem:[%s3660_s29 + $0x348] sm:$0xff]  ;;  %v2667_v59 = vld [vmem:[%s3660_s29 + $0x340] sm:$0xff] }
 0x177   : > { %1699 = vst [vmem:[%s3785_s3 + $0x338] sm:$0xff] %v1675_v0  ;;  %1698 = vst [vmem:[%s3785_s3 + $0x308] sm:$0xff] %v1674_v1  ;;  %2174 = vrot.lane.b32.xlu1 %v2782_v60, %s2998_s30  ;;  %2172 = vrot.lane.b32.xlu0 %v2781_v61, %s2998_s30 }
 0x178   : > { %v2798_v60 = vld [vmem:[%s3660_s29 + $0x758] sm:$0xff]  ;;  %v2797_v61 = vld [vmem:[%s3660_s29 + $0x750] sm:$0xff] }
 0x179   : > { %v1625_v6 = vpop.permute.xlu1 %1624  ;;  %v1623_v7 = vpop.permute.xlu0 %1622 }
 0x17a   : > { %v1677_v8 = vsel %vm1463_vm0, %v2630_v2, %v1625_v6  ;;  %v1676_v9 = vsel %vm1463_vm0, %v2629_v3, %v1623_v7  ;;  %v2670_v2 = vld [vmem:[%s3660_s29 + $0x358] sm:$0xff]  ;;  %v2669_v3 = vld [vmem:[%s3660_s29 + $0x350] sm:$0xff] }
 0x17b   : > { %1701 = vst [vmem:[%s3785_s3 + $0x398] sm:$0xff] %v1677_v8  ;;  %1700 = vst [vmem:[%s3785_s3 + $0x368] sm:$0xff] %v1676_v9  ;;  %2178 = vrot.lane.b32.xlu1 %v2784_v4, %s2998_s30  ;;  %2176 = vrot.lane.b32.xlu0 %v2783_v5, %s2998_s30 }
 0x17c   : > { %v2800_v4 = vld [vmem:[%s3660_s29 + $0x768] sm:$0xff]  ;;  %v2799_v5 = vld [vmem:[%s3660_s29 + $0x760] sm:$0xff] }
 0x17d   : > { %v1629_v14 = vpop.permute.xlu1 %1628  ;;  %v1627_v15 = vpop.permute.xlu0 %1626 }
 0x17e   : > { %v1679_v16 = vsel %vm1463_vm0, %v2632_v10, %v1629_v14  ;;  %v1678_v17 = vsel %vm1463_vm0, %v2631_v11, %v1627_v15  ;;  %v2672_v10 = vld [vmem:[%s3660_s29 + $0x368] sm:$0xff]  ;;  %v2671_v11 = vld [vmem:[%s3660_s29 + $0x360] sm:$0xff] }
 0x17f   : > { %1703 = vst [vmem:[%s3785_s3 + $0x3f8] sm:$0xff] %v1679_v16  ;;  %1702 = vst [vmem:[%s3785_s3 + $0x3c8] sm:$0xff] %v1678_v17  ;;  %2182 = vrot.lane.b32.xlu1 %v2786_v12, %s2998_s30  ;;  %2180 = vrot.lane.b32.xlu0 %v2785_v13, %s2998_s30 }
 0x180   : > { %v2802_v12 = vld [vmem:[%s3660_s29 + $0x778] sm:$0xff]  ;;  %v2801_v13 = vld [vmem:[%s3660_s29 + $0x770] sm:$0xff] }
 0x181   : > { %v1633_v22 = vpop.permute.xlu1 %1632  ;;  %v1631_v23 = vpop.permute.xlu0 %1630 }
 0x182   : > { %v1681_v24 = vsel %vm1463_vm0, %v2634_v18, %v1633_v22  ;;  %v1680_v25 = vsel %vm1463_vm0, %v2633_v19, %v1631_v23  ;;  %v2674_v18 = vld [vmem:[%s3660_s29 + $0x378] sm:$0xff]  ;;  %v2673_v19 = vld [vmem:[%s3660_s29 + $0x370] sm:$0xff] }
 0x183   : > { %1705 = vst [vmem:[%s3785_s3 + $0x458] sm:$0xff] %v1681_v24  ;;  %1704 = vst [vmem:[%s3785_s3 + $0x428] sm:$0xff] %v1680_v25  ;;  %2186 = vrot.lane.b32.xlu1 %v2788_v20, %s2998_s30  ;;  %2184 = vrot.lane.b32.xlu0 %v2787_v21, %s2998_s30 }
 0x184   : > { %v2828_v20 = vld [vmem:[%s3660_s29 + $0x848] sm:$0xff]  ;;  %v2827_v21 = vld [vmem:[%s3660_s29 + $0x840] sm:$0xff] }
 0x185   : > { %v1783_v30 = vpop.permute.xlu1 %1782  ;;  %v1781_v31 = vpop.permute.xlu0 %1780 }
 0x186   : > { %v1853_v32 = vsel %vm1463_vm0, %v2660_v26, %v1783_v30  ;;  %v1852_v33 = vsel %vm1463_vm0, %v2659_v27, %v1781_v31  ;;  %v2676_v26 = vld [vmem:[%s3660_s29 + $0x388] sm:$0xff]  ;;  %v2675_v27 = vld [vmem:[%s3660_s29 + $0x380] sm:$0xff] }
 0x187   : > { %1877 = vst [vmem:[%s3785_s3 + $0x40] sm:$0xff] %v1853_v32  ;;  %1876 = vst [vmem:[%s3785_s3 + $0x10] sm:$0xff] %v1852_v33  ;;  %2190 = vrot.lane.b32.xlu1 %v2790_v28, %s2998_s30  ;;  %2188 = vrot.lane.b32.xlu0 %v2789_v29, %s2998_s30 }
 0x188   : > { %v2830_v28 = vld [vmem:[%s3660_s29 + $0x858] sm:$0xff]  ;;  %v2829_v29 = vld [vmem:[%s3660_s29 + $0x850] sm:$0xff] }
 0x189   : > { %v1787_v38 = vpop.permute.xlu1 %1786  ;;  %v1785_v39 = vpop.permute.xlu0 %1784 }
 0x18a   : > { %v1855_v40 = vsel %vm1463_vm0, %v2662_v34, %v1787_v38  ;;  %v1854_v41 = vsel %vm1463_vm0, %v2661_v35, %v1785_v39  ;;  %v2678_v34 = vld [vmem:[%s3660_s29 + $0x398] sm:$0xff]  ;;  %v2677_v35 = vld [vmem:[%s3660_s29 + $0x390] sm:$0xff] }
 0x18b   : > { %1879 = vst [vmem:[%s3785_s3 + $0xa0] sm:$0xff] %v1855_v40  ;;  %1878 = vst [vmem:[%s3785_s3 + $0x70] sm:$0xff] %v1854_v41  ;;  %2194 = vrot.lane.b32.xlu1 %v2792_v36, %s2998_s30  ;;  %2192 = vrot.lane.b32.xlu0 %v2791_v37, %s2998_s30 }
 0x18c   : > { %v2832_v36 = vld [vmem:[%s3660_s29 + $0x868] sm:$0xff]  ;;  %v2831_v37 = vld [vmem:[%s3660_s29 + $0x860] sm:$0xff] }
 0x18d   : > { %v1791_v46 = vpop.permute.xlu1 %1790  ;;  %v1789_v47 = vpop.permute.xlu0 %1788 }
 0x18e   : > { %v1857_v48 = vsel %vm1463_vm0, %v2664_v42, %v1791_v46  ;;  %v1856_v49 = vsel %vm1463_vm0, %v2663_v43, %v1789_v47  ;;  %v2680_v42 = vld [vmem:[%s3660_s29 + $0x3a8] sm:$0xff]  ;;  %v2679_v43 = vld [vmem:[%s3660_s29 + $0x3a0] sm:$0xff] }
 0x18f   : > { %1881 = vst [vmem:[%s3785_s3 + $0x100] sm:$0xff] %v1857_v48  ;;  %1880 = vst [vmem:[%s3785_s3 + $0xd0] sm:$0xff] %v1856_v49  ;;  %2198 = vrot.lane.b32.xlu1 %v2794_v44, %s2998_s30  ;;  %2196 = vrot.lane.b32.xlu0 %v2793_v45, %s2998_s30 }
 0x190   : > { %v2834_v44 = vld [vmem:[%s3660_s29 + $0x878] sm:$0xff]  ;;  %v2833_v45 = vld [vmem:[%s3660_s29 + $0x870] sm:$0xff] }
 0x191   : > { %v1795_v54 = vpop.permute.xlu1 %1794  ;;  %v1793_v55 = vpop.permute.xlu0 %1792 }
 0x192   : > { %v1859_v56 = vsel %vm1463_vm0, %v2666_v50, %v1795_v54  ;;  %v1858_v57 = vsel %vm1463_vm0, %v2665_v51, %v1793_v55  ;;  %v2682_v50 = vld [vmem:[%s3660_s29 + $0x3b8] sm:$0xff]  ;;  %v2681_v51 = vld [vmem:[%s3660_s29 + $0x3b0] sm:$0xff] }
 0x193   : > { %1883 = vst [vmem:[%s3785_s3 + $0x160] sm:$0xff] %v1859_v56  ;;  %1882 = vst [vmem:[%s3785_s3 + $0x130] sm:$0xff] %v1858_v57  ;;  %2202 = vrot.lane.b32.xlu1 %v2796_v52, %s2998_s30  ;;  %2200 = vrot.lane.b32.xlu0 %v2795_v53, %s2998_s30 }
 0x194   : > { %v2836_v52 = vld [vmem:[%s3660_s29 + $0x888] sm:$0xff]  ;;  %v2835_v53 = vld [vmem:[%s3660_s29 + $0x880] sm:$0xff] }
 0x195   : > { %v1799_v62 = vpop.permute.xlu1 %1798  ;;  %v1797_v63 = vpop.permute.xlu0 %1796 }
 0x196   : > { %v1861_v0 = vsel %vm1463_vm0, %v2668_v58, %v1799_v62  ;;  %v1860_v1 = vsel %vm1463_vm0, %v2667_v59, %v1797_v63  ;;  %v2708_v58 = vld [vmem:[%s3660_s29 + $0x488] sm:$0xff]  ;;  %v2707_v59 = vld [vmem:[%s3660_s29 + $0x480] sm:$0xff] }
 0x197   : > { %1885 = vst [vmem:[%s3785_s3 + $0x1c0] sm:$0xff] %v1861_v0  ;;  %1884 = vst [vmem:[%s3785_s3 + $0x190] sm:$0xff] %v1860_v1  ;;  %2206 = vrot.lane.b32.xlu1 %v2798_v60, %s2998_s30  ;;  %2204 = vrot.lane.b32.xlu0 %v2797_v61, %s2998_s30 }
 0x198   : > { %v2838_v60 = vld [vmem:[%s3660_s29 + $0x898] sm:$0xff]  ;;  %v2837_v61 = vld [vmem:[%s3660_s29 + $0x890] sm:$0xff] }
 0x199   : > { %v1803_v6 = vpop.permute.xlu1 %1802  ;;  %v1801_v7 = vpop.permute.xlu0 %1800 }
 0x19a   : > { %v1863_v8 = vsel %vm1463_vm0, %v2670_v2, %v1803_v6  ;;  %v1862_v9 = vsel %vm1463_vm0, %v2669_v3, %v1801_v7  ;;  %v2710_v2 = vld [vmem:[%s3660_s29 + $0x498] sm:$0xff]  ;;  %v2709_v3 = vld [vmem:[%s3660_s29 + $0x490] sm:$0xff] }
 0x19b   : > { %1887 = vst [vmem:[%s3785_s3 + $0x220] sm:$0xff] %v1863_v8  ;;  %1886 = vst [vmem:[%s3785_s3 + $0x1f0] sm:$0xff] %v1862_v9  ;;  %2210 = vrot.lane.b32.xlu1 %v2800_v4, %s2998_s30  ;;  %2208 = vrot.lane.b32.xlu0 %v2799_v5, %s2998_s30 }
 0x19c   : > { %v2840_v4 = vld [vmem:[%s3660_s29 + $0x8a8] sm:$0xff]  ;;  %v2839_v5 = vld [vmem:[%s3660_s29 + $0x8a0] sm:$0xff] }
 0x19d   : > { %v1807_v14 = vpop.permute.xlu1 %1806  ;;  %v1805_v15 = vpop.permute.xlu0 %1804 }
 0x19e   : > { %v1865_v16 = vsel %vm1463_vm0, %v2672_v10, %v1807_v14  ;;  %v1864_v17 = vsel %vm1463_vm0, %v2671_v11, %v1805_v15  ;;  %v2712_v10 = vld [vmem:[%s3660_s29 + $0x4a8] sm:$0xff]  ;;  %v2711_v11 = vld [vmem:[%s3660_s29 + $0x4a0] sm:$0xff] }
 0x19f   : > { %1889 = vst [vmem:[%s3785_s3 + $0x280] sm:$0xff] %v1865_v16  ;;  %1888 = vst [vmem:[%s3785_s3 + $0x250] sm:$0xff] %v1864_v17  ;;  %2214 = vrot.lane.b32.xlu1 %v2802_v12, %s2998_s30  ;;  %2212 = vrot.lane.b32.xlu0 %v2801_v13, %s2998_s30 }
 0x1a0   : > { %v2842_v12 = vld [vmem:[%s3660_s29 + $0x8b8] sm:$0xff]  ;;  %v2841_v13 = vld [vmem:[%s3660_s29 + $0x8b0] sm:$0xff] }
 0x1a1   : > { %v1811_v22 = vpop.permute.xlu1 %1810  ;;  %v1809_v23 = vpop.permute.xlu0 %1808 }
 0x1a2   : > { %v1867_v24 = vsel %vm1463_vm0, %v2674_v18, %v1811_v22  ;;  %v1866_v25 = vsel %vm1463_vm0, %v2673_v19, %v1809_v23  ;;  %v2714_v18 = vld [vmem:[%s3660_s29 + $0x4b8] sm:$0xff]  ;;  %v2713_v19 = vld [vmem:[%s3660_s29 + $0x4b0] sm:$0xff] }
 0x1a3   : > { %1891 = vst [vmem:[%s3785_s3 + $0x2e0] sm:$0xff] %v1867_v24  ;;  %1890 = vst [vmem:[%s3785_s3 + $0x2b0] sm:$0xff] %v1866_v25  ;;  %2364 = vrot.lane.b32.xlu1 %v2828_v20, %s2998_s30  ;;  %2362 = vrot.lane.b32.xlu0 %v2827_v21, %s2998_s30 }
 0x1a4   : > { %v2844_v20 = vld [vmem:[%s3660_s29 + $0x8c8] sm:$0xff]  ;;  %v2843_v21 = vld [vmem:[%s3660_s29 + $0x8c0] sm:$0xff] }
 0x1a5   : > { %v1815_v30 = vpop.permute.xlu1 %1814  ;;  %v1813_v31 = vpop.permute.xlu0 %1812 }
 0x1a6   : > { %v1869_v32 = vsel %vm1463_vm0, %v2676_v26, %v1815_v30  ;;  %v1868_v33 = vsel %vm1463_vm0, %v2675_v27, %v1813_v31  ;;  %v2716_v26 = vld [vmem:[%s3660_s29 + $0x4c8] sm:$0xff]  ;;  %v2715_v27 = vld [vmem:[%s3660_s29 + $0x4c0] sm:$0xff] }
 0x1a7   : > { %1893 = vst [vmem:[%s3785_s3 + $0x340] sm:$0xff] %v1869_v32  ;;  %1892 = vst [vmem:[%s3785_s3 + $0x310] sm:$0xff] %v1868_v33  ;;  %2368 = vrot.lane.b32.xlu1 %v2830_v28, %s2998_s30  ;;  %2366 = vrot.lane.b32.xlu0 %v2829_v29, %s2998_s30 }
 0x1a8   : > { %v2846_v28 = vld [vmem:[%s3660_s29 + $0x8d8] sm:$0xff]  ;;  %v2845_v29 = vld [vmem:[%s3660_s29 + $0x8d0] sm:$0xff] }
 0x1a9   : > { %v1819_v38 = vpop.permute.xlu1 %1818  ;;  %v1817_v39 = vpop.permute.xlu0 %1816 }
 0x1aa   : > { %v1871_v40 = vsel %vm1463_vm0, %v2678_v34, %v1819_v38  ;;  %v1870_v41 = vsel %vm1463_vm0, %v2677_v35, %v1817_v39  ;;  %v2718_v34 = vld [vmem:[%s3660_s29 + $0x4d8] sm:$0xff]  ;;  %v2717_v35 = vld [vmem:[%s3660_s29 + $0x4d0] sm:$0xff] }
 0x1ab   : > { %1895 = vst [vmem:[%s3785_s3 + $0x3a0] sm:$0xff] %v1871_v40  ;;  %1894 = vst [vmem:[%s3785_s3 + $0x370] sm:$0xff] %v1870_v41  ;;  %2372 = vrot.lane.b32.xlu1 %v2832_v36, %s2998_s30  ;;  %2370 = vrot.lane.b32.xlu0 %v2831_v37, %s2998_s30 }
 0x1ac   : > { %v2848_v36 = vld [vmem:[%s3660_s29 + $0x8e8] sm:$0xff]  ;;  %v2847_v37 = vld [vmem:[%s3660_s29 + $0x8e0] sm:$0xff] }
 0x1ad   : > { %v1823_v46 = vpop.permute.xlu1 %1822  ;;  %v1821_v47 = vpop.permute.xlu0 %1820 }
 0x1ae   : > { %v1873_v48 = vsel %vm1463_vm0, %v2680_v42, %v1823_v46  ;;  %v1872_v49 = vsel %vm1463_vm0, %v2679_v43, %v1821_v47  ;;  %v2720_v42 = vld [vmem:[%s3660_s29 + $0x4e8] sm:$0xff]  ;;  %v2719_v43 = vld [vmem:[%s3660_s29 + $0x4e0] sm:$0xff] }
 0x1af   : > { %1897 = vst [vmem:[%s3785_s3 + $0x400] sm:$0xff] %v1873_v48  ;;  %1896 = vst [vmem:[%s3785_s3 + $0x3d0] sm:$0xff] %v1872_v49  ;;  %2376 = vrot.lane.b32.xlu1 %v2834_v44, %s2998_s30  ;;  %2374 = vrot.lane.b32.xlu0 %v2833_v45, %s2998_s30 }
 0x1b0   : > { %v2850_v44 = vld [vmem:[%s3660_s29 + $0x8f8] sm:$0xff]  ;;  %v2849_v45 = vld [vmem:[%s3660_s29 + $0x8f0] sm:$0xff] }
 0x1b1   : > { %v1827_v54 = vpop.permute.xlu1 %1826  ;;  %v1825_v55 = vpop.permute.xlu0 %1824 }
 0x1b2   : > { %v1875_v56 = vsel %vm1463_vm0, %v2682_v50, %v1827_v54  ;;  %v1874_v57 = vsel %vm1463_vm0, %v2681_v51, %v1825_v55  ;;  %v2722_v50 = vld [vmem:[%s3660_s29 + $0x4f8] sm:$0xff]  ;;  %v2721_v51 = vld [vmem:[%s3660_s29 + $0x4f0] sm:$0xff] }
 0x1b3   : > { %1899 = vst [vmem:[%s3785_s3 + $0x460] sm:$0xff] %v1875_v56  ;;  %1898 = vst [vmem:[%s3785_s3 + $0x430] sm:$0xff] %v1874_v57  ;;  %2380 = vrot.lane.b32.xlu1 %v2836_v52, %s2998_s30  ;;  %2378 = vrot.lane.b32.xlu0 %v2835_v53, %s2998_s30 }
 0x1b4   : > { %v2724_v56 = vld [vmem:[%s3660_s29 + $0x508] sm:$0xff]  ;;  %v2723_v57 = vld [vmem:[%s3660_s29 + $0x500] sm:$0xff] }
 0x1b5   : > { %v1977_v62 = vpop.permute.xlu1 %1976  ;;  %v1975_v63 = vpop.permute.xlu0 %1974 }
 0x1b6   : > { %v2047_v0 = vsel %vm1463_vm0, %v2708_v58, %v1977_v62  ;;  %v2046_v1 = vsel %vm1463_vm0, %v2707_v59, %v1975_v63  ;;  %v2726_v62 = vld [vmem:[%s3660_s29 + $0x518] sm:$0xff]  ;;  %v2725_v63 = vld [vmem:[%s3660_s29 + $0x510] sm:$0xff] }
 0x1b7   : > { %2071 = vst [vmem:[%s3785_s3 + $0x48] sm:$0xff] %v2047_v0  ;;  %2070 = vst [vmem:[%s3785_s3 + $0x18] sm:$0xff] %v2046_v1  ;;  %2384 = vrot.lane.b32.xlu1 %v2838_v60, %s2998_s30  ;;  %2382 = vrot.lane.b32.xlu0 %v2837_v61, %s2998_s30 }
 0x1b9   : > { %v1981_v6 = vpop.permute.xlu1 %1980  ;;  %v1979_v7 = vpop.permute.xlu0 %1978 }
 0x1ba   : > { %v2049_v8 = vsel %vm1463_vm0, %v2710_v2, %v1981_v6  ;;  %v2048_v9 = vsel %vm1463_vm0, %v2709_v3, %v1979_v7 }
 0x1bb   : > { %2073 = vst [vmem:[%s3785_s3 + $0xa8] sm:$0xff] %v2049_v8  ;;  %2072 = vst [vmem:[%s3785_s3 + $0x78] sm:$0xff] %v2048_v9  ;;  %2388 = vrot.lane.b32.xlu1 %v2840_v4, %s2998_s30  ;;  %2386 = vrot.lane.b32.xlu0 %v2839_v5, %s2998_s30 }
 0x1bc   : > { %v2728_v4 = vld [vmem:[%s3660_s29 + $0x528] sm:$0xff]  ;;  %v2727_v5 = vld [vmem:[%s3660_s29 + $0x520] sm:$0xff] }
 0x1bd   : > { %v1985_v14 = vpop.permute.xlu1 %1984  ;;  %v1983_v15 = vpop.permute.xlu0 %1982 }
 0x1be   : > { %v2051_v16 = vsel %vm1463_vm0, %v2712_v10, %v1985_v14  ;;  %v2050_v17 = vsel %vm1463_vm0, %v2711_v11, %v1983_v15  ;;  %v2730_v10 = vld [vmem:[%s3660_s29 + $0x538] sm:$0xff]  ;;  %v2729_v11 = vld [vmem:[%s3660_s29 + $0x530] sm:$0xff] }
 0x1bf   : > { %2075 = vst [vmem:[%s3785_s3 + $0x108] sm:$0xff] %v2051_v16  ;;  %2074 = vst [vmem:[%s3785_s3 + $0xd8] sm:$0xff] %v2050_v17  ;;  %2392 = vrot.lane.b32.xlu1 %v2842_v12, %s2998_s30  ;;  %2390 = vrot.lane.b32.xlu0 %v2841_v13, %s2998_s30 }
 0x1c0   : > { %v2756_v16 = vld [vmem:[%s3660_s29 + $0x608] sm:$0xff]  ;;  %v2755_v17 = vld [vmem:[%s3660_s29 + $0x600] sm:$0xff] }
 0x1c1   : > { %v1989_v22 = vpop.permute.xlu1 %1988  ;;  %v1987_v23 = vpop.permute.xlu0 %1986 }
 0x1c2   : > { %v2053_v24 = vsel %vm1463_vm0, %v2714_v18, %v1989_v22  ;;  %v2052_v25 = vsel %vm1463_vm0, %v2713_v19, %v1987_v23  ;;  %v2758_v22 = vld [vmem:[%s3660_s29 + $0x618] sm:$0xff]  ;;  %v2757_v23 = vld [vmem:[%s3660_s29 + $0x610] sm:$0xff] }
 0x1c3   : > { %2077 = vst [vmem:[%s3785_s3 + $0x168] sm:$0xff] %v2053_v24  ;;  %2076 = vst [vmem:[%s3785_s3 + $0x138] sm:$0xff] %v2052_v25  ;;  %2396 = vrot.lane.b32.xlu1 %v2844_v20, %s2998_s30  ;;  %2394 = vrot.lane.b32.xlu0 %v2843_v21, %s2998_s30 }
 0x1c5   : > { %v1993_v30 = vpop.permute.xlu1 %1992  ;;  %v1991_v31 = vpop.permute.xlu0 %1990 }
 0x1c6   : > { %v2055_v32 = vsel %vm1463_vm0, %v2716_v26, %v1993_v30  ;;  %v2054_v33 = vsel %vm1463_vm0, %v2715_v27, %v1991_v31 }
 0x1c7   : > { %2079 = vst [vmem:[%s3785_s3 + $0x1c8] sm:$0xff] %v2055_v32  ;;  %2078 = vst [vmem:[%s3785_s3 + $0x198] sm:$0xff] %v2054_v33  ;;  %2400 = vrot.lane.b32.xlu1 %v2846_v28, %s2998_s30  ;;  %2398 = vrot.lane.b32.xlu0 %v2845_v29, %s2998_s30 }
 0x1c8   : > { %v2760_v28 = vld [vmem:[%s3660_s29 + $0x628] sm:$0xff]  ;;  %v2759_v29 = vld [vmem:[%s3660_s29 + $0x620] sm:$0xff] }
 0x1c9   : > { %v1997_v38 = vpop.permute.xlu1 %1996  ;;  %v1995_v39 = vpop.permute.xlu0 %1994 }
 0x1ca   : > { %v2057_v40 = vsel %vm1463_vm0, %v2718_v34, %v1997_v38  ;;  %v2056_v41 = vsel %vm1463_vm0, %v2717_v35, %v1995_v39  ;;  %v2762_v34 = vld [vmem:[%s3660_s29 + $0x638] sm:$0xff]  ;;  %v2761_v35 = vld [vmem:[%s3660_s29 + $0x630] sm:$0xff] }
 0x1cb   : > { %2081 = vst [vmem:[%s3785_s3 + $0x228] sm:$0xff] %v2057_v40  ;;  %2080 = vst [vmem:[%s3785_s3 + $0x1f8] sm:$0xff] %v2056_v41  ;;  %2404 = vrot.lane.b32.xlu1 %v2848_v36, %s2998_s30  ;;  %2402 = vrot.lane.b32.xlu0 %v2847_v37, %s2998_s30 }
 0x1cc   : > { %v2764_v40 = vld [vmem:[%s3660_s29 + $0x648] sm:$0xff]  ;;  %v2763_v41 = vld [vmem:[%s3660_s29 + $0x640] sm:$0xff] }
 0x1cd   : > { %v2001_v46 = vpop.permute.xlu1 %2000  ;;  %v1999_v47 = vpop.permute.xlu0 %1998 }
 0x1ce   : > { %v2059_v48 = vsel %vm1463_vm0, %v2720_v42, %v2001_v46  ;;  %v2058_v49 = vsel %vm1463_vm0, %v2719_v43, %v1999_v47  ;;  %v2766_v46 = vld [vmem:[%s3660_s29 + $0x658] sm:$0xff]  ;;  %v2765_v47 = vld [vmem:[%s3660_s29 + $0x650] sm:$0xff] }
 0x1cf   : > { %2083 = vst [vmem:[%s3785_s3 + $0x288] sm:$0xff] %v2059_v48  ;;  %2082 = vst [vmem:[%s3785_s3 + $0x258] sm:$0xff] %v2058_v49  ;;  %2408 = vrot.lane.b32.xlu1 %v2850_v44, %s2998_s30  ;;  %2406 = vrot.lane.b32.xlu0 %v2849_v45, %s2998_s30 }
 0x1d1   : > { %v2005_v52 = vpop.permute.xlu1 %2004  ;;  %v2003_v53 = vpop.permute.xlu0 %2002 }
 0x1d2   : > { %v2061_v54 = vsel %vm1463_vm0, %v2722_v50, %v2005_v52  ;;  %v2060_v55 = vsel %vm1463_vm0, %v2721_v51, %v2003_v53  ;;  %v2768_v52 = vld [vmem:[%s3660_s29 + $0x668] sm:$0xff]  ;;  %v2767_v53 = vld [vmem:[%s3660_s29 + $0x660] sm:$0xff] }
 0x1d3   : > { %2085 = vst [vmem:[%s3785_s3 + $0x2e8] sm:$0xff] %v2061_v54  ;;  %2084 = vst [vmem:[%s3785_s3 + $0x2b8] sm:$0xff] %v2060_v55 }
 0x1d5   : > { %v2009_v58 = vpop.permute.xlu1 %2008  ;;  %v2007_v59 = vpop.permute.xlu0 %2006 }
 0x1d6   : > { %v2063_v60 = vsel %vm1463_vm0, %v2724_v56, %v2009_v58  ;;  %v2062_v61 = vsel %vm1463_vm0, %v2723_v57, %v2007_v59  ;;  %v2770_v58 = vld [vmem:[%s3660_s29 + $0x678] sm:$0xff]  ;;  %v2769_v59 = vld [vmem:[%s3660_s29 + $0x670] sm:$0xff] }
 0x1d7   : > { %2087 = vst [vmem:[%s3785_s3 + $0x348] sm:$0xff] %v2063_v60  ;;  %2086 = vst [vmem:[%s3785_s3 + $0x318] sm:$0xff] %v2062_v61 }
 0x1d9   : > { %v2013_v0 = vpop.permute.xlu1 %2012  ;;  %v2011_v1 = vpop.permute.xlu0 %2010 }
 0x1da   : > { %v2065_v2 = vsel %vm1463_vm0, %v2726_v62, %v2013_v0  ;;  %v2064_v3 = vsel %vm1463_vm0, %v2725_v63, %v2011_v1  ;;  %v2772_v0 = vld [vmem:[%s3660_s29 + $0x688] sm:$0xff]  ;;  %v2771_v1 = vld [vmem:[%s3660_s29 + $0x680] sm:$0xff] }
 0x1db   : > { %2089 = vst [vmem:[%s3785_s3 + $0x3a8] sm:$0xff] %v2065_v2  ;;  %2088 = vst [vmem:[%s3785_s3 + $0x378] sm:$0xff] %v2064_v3 }
 0x1dd   : > { %v2017_v6 = vpop.permute.xlu1 %2016  ;;  %v2015_v7 = vpop.permute.xlu0 %2014 }
 0x1de   : > { %v2067_v8 = vsel %vm1463_vm0, %v2728_v4, %v2017_v6  ;;  %v2066_v9 = vsel %vm1463_vm0, %v2727_v5, %v2015_v7  ;;  %v2774_v6 = vld [vmem:[%s3660_s29 + $0x698] sm:$0xff]  ;;  %v2773_v7 = vld [vmem:[%s3660_s29 + $0x690] sm:$0xff] }
 0x1df   : > { %2091 = vst [vmem:[%s3785_s3 + $0x408] sm:$0xff] %v2067_v8  ;;  %2090 = vst [vmem:[%s3785_s3 + $0x3d8] sm:$0xff] %v2066_v9 }
 0x1e1   : > { %v2021_v12 = vpop.permute.xlu1 %2020  ;;  %v2019_v13 = vpop.permute.xlu0 %2018 }
 0x1e2   : > { %v2069_v14 = vsel %vm1463_vm0, %v2730_v10, %v2021_v12  ;;  %v2068_v15 = vsel %vm1463_vm0, %v2729_v11, %v2019_v13  ;;  %v2776_v12 = vld [vmem:[%s3660_s29 + $0x6a8] sm:$0xff]  ;;  %v2775_v13 = vld [vmem:[%s3660_s29 + $0x6a0] sm:$0xff] }
 0x1e3   : > { %2093 = vst [vmem:[%s3785_s3 + $0x468] sm:$0xff] %v2069_v14  ;;  %2092 = vst [vmem:[%s3785_s3 + $0x438] sm:$0xff] %v2068_v15 }
 0x1e5   : > { %v2171_v18 = vpop.permute.xlu1 %2170  ;;  %v2169_v19 = vpop.permute.xlu0 %2168 }
 0x1e6   : > { %v2241_v20 = vsel %vm1463_vm0, %v2756_v16, %v2171_v18  ;;  %v2240_v21 = vsel %vm1463_vm0, %v2755_v17, %v2169_v19  ;;  %v2778_v18 = vld [vmem:[%s3660_s29 + $0x6b8] sm:$0xff]  ;;  %v2777_v19 = vld [vmem:[%s3660_s29 + $0x6b0] sm:$0xff] }
 0x1e7   : > { %2265 = vst [vmem:[%s3785_s3 + $0x50] sm:$0xff] %v2241_v20  ;;  %2264 = vst [vmem:[%s3785_s3 + $0x20] sm:$0xff] %v2240_v21 }
 0x1e9   : > { %v2175_v24 = vpop.permute.xlu1 %2174  ;;  %v2173_v25 = vpop.permute.xlu0 %2172 }
 0x1ea   : > { %v2243_v26 = vsel %vm1463_vm0, %v2758_v22, %v2175_v24  ;;  %v2242_v27 = vsel %vm1463_vm0, %v2757_v23, %v2173_v25  ;;  %v2804_v24 = vld [vmem:[%s3660_s29 + $0x788] sm:$0xff]  ;;  %v2803_v25 = vld [vmem:[%s3660_s29 + $0x780] sm:$0xff] }
 0x1eb   : > { %2267 = vst [vmem:[%s3785_s3 + $0xb0] sm:$0xff] %v2243_v26  ;;  %2266 = vst [vmem:[%s3785_s3 + $0x80] sm:$0xff] %v2242_v27 }
 0x1ed   : > { %v2179_v30 = vpop.permute.xlu1 %2178  ;;  %v2177_v31 = vpop.permute.xlu0 %2176 }
 0x1ee   : > { %v2245_v32 = vsel %vm1463_vm0, %v2760_v28, %v2179_v30  ;;  %v2244_v33 = vsel %vm1463_vm0, %v2759_v29, %v2177_v31  ;;  %v2806_v30 = vld [vmem:[%s3660_s29 + $0x798] sm:$0xff]  ;;  %v2805_v31 = vld [vmem:[%s3660_s29 + $0x790] sm:$0xff] }
 0x1ef   : > { %2269 = vst [vmem:[%s3785_s3 + $0x110] sm:$0xff] %v2245_v32  ;;  %2268 = vst [vmem:[%s3785_s3 + $0xe0] sm:$0xff] %v2244_v33 }
 0x1f1   : > { %v2183_v36 = vpop.permute.xlu1 %2182  ;;  %v2181_v37 = vpop.permute.xlu0 %2180 }
 0x1f2   : > { %v2247_v38 = vsel %vm1463_vm0, %v2762_v34, %v2183_v36  ;;  %v2246_v39 = vsel %vm1463_vm0, %v2761_v35, %v2181_v37  ;;  %v2808_v36 = vld [vmem:[%s3660_s29 + $0x7a8] sm:$0xff]  ;;  %v2807_v37 = vld [vmem:[%s3660_s29 + $0x7a0] sm:$0xff] }
 0x1f3   : > { %2271 = vst [vmem:[%s3785_s3 + $0x170] sm:$0xff] %v2247_v38  ;;  %2270 = vst [vmem:[%s3785_s3 + $0x140] sm:$0xff] %v2246_v39 }
 0x1f5   : > { %v2187_v42 = vpop.permute.xlu1 %2186  ;;  %v2185_v43 = vpop.permute.xlu0 %2184 }
 0x1f6   : > { %v2249_v44 = vsel %vm1463_vm0, %v2764_v40, %v2187_v42  ;;  %v2248_v45 = vsel %vm1463_vm0, %v2763_v41, %v2185_v43  ;;  %v2810_v42 = vld [vmem:[%s3660_s29 + $0x7b8] sm:$0xff]  ;;  %v2809_v43 = vld [vmem:[%s3660_s29 + $0x7b0] sm:$0xff] }
 0x1f7   : > { %2273 = vst [vmem:[%s3785_s3 + $0x1d0] sm:$0xff] %v2249_v44  ;;  %2272 = vst [vmem:[%s3785_s3 + $0x1a0] sm:$0xff] %v2248_v45 }
 0x1f9   : > { %v2191_v48 = vpop.permute.xlu1 %2190  ;;  %v2189_v49 = vpop.permute.xlu0 %2188 }
 0x1fa   : > { %v2251_v50 = vsel %vm1463_vm0, %v2766_v46, %v2191_v48  ;;  %v2250_v51 = vsel %vm1463_vm0, %v2765_v47, %v2189_v49  ;;  %v2812_v48 = vld [vmem:[%s3660_s29 + $0x7c8] sm:$0xff]  ;;  %v2811_v49 = vld [vmem:[%s3660_s29 + $0x7c0] sm:$0xff] }
 0x1fb   : > { %2275 = vst [vmem:[%s3785_s3 + $0x230] sm:$0xff] %v2251_v50  ;;  %2274 = vst [vmem:[%s3785_s3 + $0x200] sm:$0xff] %v2250_v51 }
 0x1fd   : > { %v2195_v54 = vpop.permute.xlu1 %2194  ;;  %v2193_v55 = vpop.permute.xlu0 %2192 }
 0x1fe   : > { %v2253_v56 = vsel %vm1463_vm0, %v2768_v52, %v2195_v54  ;;  %v2252_v57 = vsel %vm1463_vm0, %v2767_v53, %v2193_v55  ;;  %v2814_v54 = vld [vmem:[%s3660_s29 + $0x7d8] sm:$0xff]  ;;  %v2813_v55 = vld [vmem:[%s3660_s29 + $0x7d0] sm:$0xff] }
 0x1ff   : > { %2277 = vst [vmem:[%s3785_s3 + $0x290] sm:$0xff] %v2253_v56  ;;  %2276 = vst [vmem:[%s3785_s3 + $0x260] sm:$0xff] %v2252_v57 }
 0x201   : > { %v2199_v60 = vpop.permute.xlu1 %2198  ;;  %v2197_v61 = vpop.permute.xlu0 %2196 }
 0x202   : > { %v2255_v62 = vsel %vm1463_vm0, %v2770_v58, %v2199_v60  ;;  %v2254_v63 = vsel %vm1463_vm0, %v2769_v59, %v2197_v61  ;;  %v2816_v60 = vld [vmem:[%s3660_s29 + $0x7e8] sm:$0xff]  ;;  %v2815_v61 = vld [vmem:[%s3660_s29 + $0x7e0] sm:$0xff] }
 0x203   : > { %2279 = vst [vmem:[%s3785_s3 + $0x2f0] sm:$0xff] %v2255_v62  ;;  %2278 = vst [vmem:[%s3785_s3 + $0x2c0] sm:$0xff] %v2254_v63 }
 0x205   : > { %v2203_v2 = vpop.permute.xlu1 %2202  ;;  %v2201_v3 = vpop.permute.xlu0 %2200 }
 0x206   : > { %v2257_v4 = vsel %vm1463_vm0, %v2772_v0, %v2203_v2  ;;  %v2256_v5 = vsel %vm1463_vm0, %v2771_v1, %v2201_v3  ;;  %v2818_v2 = vld [vmem:[%s3660_s29 + $0x7f8] sm:$0xff]  ;;  %v2817_v3 = vld [vmem:[%s3660_s29 + $0x7f0] sm:$0xff] }
 0x207   : > { %2281 = vst [vmem:[%s3785_s3 + $0x350] sm:$0xff] %v2257_v4  ;;  %2280 = vst [vmem:[%s3785_s3 + $0x320] sm:$0xff] %v2256_v5 }
 0x209   : > { %v2207_v8 = vpop.permute.xlu1 %2206  ;;  %v2205_v9 = vpop.permute.xlu0 %2204 }
 0x20a   : > { %v2259_v10 = vsel %vm1463_vm0, %v2774_v6, %v2207_v8  ;;  %v2258_v11 = vsel %vm1463_vm0, %v2773_v7, %v2205_v9  ;;  %v2820_v8 = vld [vmem:[%s3660_s29 + $0x808] sm:$0xff]  ;;  %v2819_v9 = vld [vmem:[%s3660_s29 + $0x800] sm:$0xff] }
 0x20b   : > { %2283 = vst [vmem:[%s3785_s3 + $0x3b0] sm:$0xff] %v2259_v10  ;;  %2282 = vst [vmem:[%s3785_s3 + $0x380] sm:$0xff] %v2258_v11 }
 0x20d   : > { %v2211_v14 = vpop.permute.xlu1 %2210  ;;  %v2209_v15 = vpop.permute.xlu0 %2208 }
 0x20e   : > { %v2261_v16 = vsel %vm1463_vm0, %v2776_v12, %v2211_v14  ;;  %v2260_v17 = vsel %vm1463_vm0, %v2775_v13, %v2209_v15  ;;  %v2822_v14 = vld [vmem:[%s3660_s29 + $0x818] sm:$0xff]  ;;  %v2821_v15 = vld [vmem:[%s3660_s29 + $0x810] sm:$0xff] }
 0x20f   : > { %2285 = vst [vmem:[%s3785_s3 + $0x410] sm:$0xff] %v2261_v16  ;;  %2284 = vst [vmem:[%s3785_s3 + $0x3e0] sm:$0xff] %v2260_v17 }
 0x211   : > { %v2215_v20 = vpop.permute.xlu1 %2214  ;;  %v2213_v21 = vpop.permute.xlu0 %2212 }
 0x212   : > { %v2263_v22 = vsel %vm1463_vm0, %v2778_v18, %v2215_v20  ;;  %v2262_v23 = vsel %vm1463_vm0, %v2777_v19, %v2213_v21  ;;  %v2824_v20 = vld [vmem:[%s3660_s29 + $0x828] sm:$0xff]  ;;  %v2823_v21 = vld [vmem:[%s3660_s29 + $0x820] sm:$0xff] }
 0x213   : > { %2287 = vst [vmem:[%s3785_s3 + $0x470] sm:$0xff] %v2263_v22  ;;  %2286 = vst [vmem:[%s3785_s3 + $0x440] sm:$0xff] %v2262_v23 }
 0x215   : > { %v2365_v26 = vpop.permute.xlu1 %2364  ;;  %v2363_v27 = vpop.permute.xlu0 %2362 }
 0x216   : > { %v2435_v28 = vsel %vm1463_vm0, %v2804_v24, %v2365_v26  ;;  %v2434_v29 = vsel %vm1463_vm0, %v2803_v25, %v2363_v27  ;;  %v2826_v26 = vld [vmem:[%s3660_s29 + $0x838] sm:$0xff]  ;;  %v2825_v27 = vld [vmem:[%s3660_s29 + $0x830] sm:$0xff] }
 0x217   : > { %2459 = vst [vmem:[%s3785_s3 + $0x58] sm:$0xff] %v2435_v28  ;;  %2458 = vst [vmem:[%s3785_s3 + $0x28] sm:$0xff] %v2434_v29 }
 0x219   : > { %v2369_v32 = vpop.permute.xlu1 %2368  ;;  %v2367_v33 = vpop.permute.xlu0 %2366 }
 0x21a   : > { %v2437_v34 = vsel %vm1463_vm0, %v2806_v30, %v2369_v32  ;;  %v2436_v35 = vsel %vm1463_vm0, %v2805_v31, %v2367_v33 }
 0x21b   : > { %2461 = vst [vmem:[%s3785_s3 + $0xb8] sm:$0xff] %v2437_v34  ;;  %2460 = vst [vmem:[%s3785_s3 + $0x88] sm:$0xff] %v2436_v35 }
 0x21d   : > { %v2373_v38 = vpop.permute.xlu1 %2372  ;;  %v2371_v39 = vpop.permute.xlu0 %2370 }
 0x21e   : > { %v2439_v40 = vsel %vm1463_vm0, %v2808_v36, %v2373_v38  ;;  %v2438_v41 = vsel %vm1463_vm0, %v2807_v37, %v2371_v39 }
 0x21f   : > { %2463 = vst [vmem:[%s3785_s3 + $0x118] sm:$0xff] %v2439_v40  ;;  %2462 = vst [vmem:[%s3785_s3 + $0xe8] sm:$0xff] %v2438_v41 }
 0x221   : > { %v2377_v44 = vpop.permute.xlu1 %2376  ;;  %v2375_v45 = vpop.permute.xlu0 %2374 }
 0x222   : > { %v2441_v46 = vsel %vm1463_vm0, %v2810_v42, %v2377_v44  ;;  %v2440_v47 = vsel %vm1463_vm0, %v2809_v43, %v2375_v45 }
 0x223   : > { %2465 = vst [vmem:[%s3785_s3 + $0x178] sm:$0xff] %v2441_v46  ;;  %2464 = vst [vmem:[%s3785_s3 + $0x148] sm:$0xff] %v2440_v47 }
 0x225   : > { %v2381_v50 = vpop.permute.xlu1 %2380  ;;  %v2379_v51 = vpop.permute.xlu0 %2378 }
 0x226   : > { %v2443_v52 = vsel %vm1463_vm0, %v2812_v48, %v2381_v50  ;;  %v2442_v53 = vsel %vm1463_vm0, %v2811_v49, %v2379_v51 }
 0x227   : > { %2467 = vst [vmem:[%s3785_s3 + $0x1d8] sm:$0xff] %v2443_v52  ;;  %2466 = vst [vmem:[%s3785_s3 + $0x1a8] sm:$0xff] %v2442_v53 }
 0x229   : > { %v2385_v56 = vpop.permute.xlu1 %2384  ;;  %v2383_v57 = vpop.permute.xlu0 %2382 }
 0x22a   : > { %v2445_v58 = vsel %vm1463_vm0, %v2814_v54, %v2385_v56  ;;  %v2444_v59 = vsel %vm1463_vm0, %v2813_v55, %v2383_v57 }
 0x22b   : > { %2469 = vst [vmem:[%s3785_s3 + $0x238] sm:$0xff] %v2445_v58  ;;  %2468 = vst [vmem:[%s3785_s3 + $0x208] sm:$0xff] %v2444_v59 }
 0x22d   : > { %v2389_v62 = vpop.permute.xlu1 %2388  ;;  %v2387_v63 = vpop.permute.xlu0 %2386 }
 0x22e   : > { %v2447_v0 = vsel %vm1463_vm0, %v2816_v60, %v2389_v62  ;;  %v2446_v1 = vsel %vm1463_vm0, %v2815_v61, %v2387_v63 }
 0x22f   : > { %2471 = vst [vmem:[%s3785_s3 + $0x298] sm:$0xff] %v2447_v0  ;;  %2470 = vst [vmem:[%s3785_s3 + $0x268] sm:$0xff] %v2446_v1 }
 0x231   : > { %v2393_v4 = vpop.permute.xlu1 %2392  ;;  %v2391_v5 = vpop.permute.xlu0 %2390 }
 0x232   : > { %v2449_v6 = vsel %vm1463_vm0, %v2818_v2, %v2393_v4  ;;  %v2448_v7 = vsel %vm1463_vm0, %v2817_v3, %v2391_v5 }
 0x233   : > { %2473 = vst [vmem:[%s3785_s3 + $0x2f8] sm:$0xff] %v2449_v6  ;;  %2472 = vst [vmem:[%s3785_s3 + $0x2c8] sm:$0xff] %v2448_v7 }
 0x235   : > { %v2397_v10 = vpop.permute.xlu1 %2396  ;;  %v2395_v11 = vpop.permute.xlu0 %2394 }
 0x236   : > { %v2451_v12 = vsel %vm1463_vm0, %v2820_v8, %v2397_v10  ;;  %v2450_v13 = vsel %vm1463_vm0, %v2819_v9, %v2395_v11 }
 0x237   : > { %2475 = vst [vmem:[%s3785_s3 + $0x358] sm:$0xff] %v2451_v12  ;;  %2474 = vst [vmem:[%s3785_s3 + $0x328] sm:$0xff] %v2450_v13 }
 0x239   : > { %v2401_v16 = vpop.permute.xlu1 %2400  ;;  %v2399_v17 = vpop.permute.xlu0 %2398 }
 0x23a   : > { %v2453_v18 = vsel %vm1463_vm0, %v2822_v14, %v2401_v16  ;;  %v2452_v19 = vsel %vm1463_vm0, %v2821_v15, %v2399_v17 }
 0x23b   : > { %2477 = vst [vmem:[%s3785_s3 + $0x3b8] sm:$0xff] %v2453_v18  ;;  %2476 = vst [vmem:[%s3785_s3 + $0x388] sm:$0xff] %v2452_v19 }
 0x23d   : > { %v2405_v22 = vpop.permute.xlu1 %2404  ;;  %v2403_v23 = vpop.permute.xlu0 %2402 }
 0x23e   : > { %v2455_v24 = vsel %vm1463_vm0, %v2824_v20, %v2405_v22  ;;  %v2454_v25 = vsel %vm1463_vm0, %v2823_v21, %v2403_v23 }
 0x23f   : > { %2479 = vst [vmem:[%s3785_s3 + $0x418] sm:$0xff] %v2455_v24  ;;  %2478 = vst [vmem:[%s3785_s3 + $0x3e8] sm:$0xff] %v2454_v25 }
 0x241   : > { %v2409_v28 = vpop.permute.xlu1 %2408  ;;  %v2407_v29 = vpop.permute.xlu0 %2406 }
 0x242   : > { %v2457_v30 = vsel %vm1463_vm0, %v2826_v26, %v2409_v28  ;;  %v2456_v31 = vsel %vm1463_vm0, %v2825_v27, %v2407_v29 }
 0x243   : > { %2481 = vst [vmem:[%s3785_s3 + $0x478] sm:$0xff] %v2457_v30  ;;  %2480 = vst [vmem:[%s3785_s3 + $0x448] sm:$0xff] %v2456_v31 }
 0x244   : > { %2931 = shalt.err (!%p2928_p7)
}
 0x245   : > { %s2932_s23 = scalar_lea.hbm %s4386_s15, 18432  ;;  %s2936_s26 = scalar_lea.hbm %s4442_s1, 36864 }
 0x246   : > { %p2933_p8 = scmp.ne.s32.totalorder %s4386_s15, %s2932_s23  ;;  %p2937_p13 = scmp.lt.u32.totalorder %s4386_s15, %s4442_s1 }
 0x247   : > { %p2938_p0 = scmp.lt.u32.totalorder %s2936_s26, %s2932_s23  ;;  %p2940_p2 = scmp.lt.u32.totalorder %s2932_s23, %s4386_s15 }
 0x248   : > { %p2934_p11 = pnand %p2933_p8, %p3051_p5 }
 0x249   : > { %p2939_p1 = por %p2938_p0, %p2937_p13 }
 0x24a   : > { %p2935_p12 = pneg %p2934_p11 }
 0x24b   : > { %p2941_p3 = por %p2940_p2, %p2939_p1 }
 0x24d   : > { %p2942_p4 = pnand %p2941_p3, %p2935_p12 }
 0x24f   : > { %2945 = shalt.err (!%p2942_p4)
}
 0x250   : > { %s3000_s30 = smov 768   ;;  %s3001_s2 = smov 48  }
 0x251   : > { %2859 = dma.vmem_to_hbm [thread:$0]  (%p3051_p5), %s4388_s5, 18432, %s4386_s15, %s2483_s9, %s3000_s30, %s3000_s30, %s3001_s2  }
 0x252 PF: > { %s2514_s3 = sand.u32 1, %s2976_s6   ;;  %p2862_p6 = pnand %p2584_p10, %p3062_p9 }
 0x253   : > { %s2515_s4 = scalar_lea.sflag [#allocation4], %s2514_s3 }
 0x254   : > { %2971 = dma.done.wait (!%p2862_p6), %s2515_s4, 18432  }
 0x255   : > { %2973 = vsyncadd (!%p2862_p6), %s2515_s4, 4294948864  ;;  %s14_s11 = sadd.s32 1, %s2996_s11   ;;  %s4445_s6 = smov %s2980_s7 }
 0x256   : > { %p11_p7 = scmp.ge.s32.totalorder %s14_s11, 4   ;;  %s4446_s7 = smov %s2984_s8 }
 0x257   : > { %s4447_s8 = smov %s3060_s18  ;;  %s4448_s9 = smov %s2992_s10 }
 0x258   : > { %s4449_s10 = smov %s4451_s14  ;;  %13 = sbr.rel (!%p11_p7) target bundleno = 4 (0x4), region = 113 }
 0x25f   :  { %2520 = vsyncpa [#allocation4], 1 }
 0x260   :  { %2522 = vsyncpa [#allocation4 + $0x1], 1 }

</bundles_post_ra>
